<compile_context>
chip_gen: v5e
topology: v5e:2x2
jax: 0.10.0
libtpu: 0.0.40
codegen_flags: <defaults>
</compile_context>

<pallas_src>
import jax
import jax.numpy as jnp
from jax.experimental import pallas as pl
from jax.experimental.pallas import tpu as pltpu

# ----------------- scaled-down synthetic config (lane-dense) -----------------
B, S = 2, 8
H = 128                # hidden_size (768 in the original module)
N_HEADS = 4
D_HEAD = H // N_HEADS
INTER = 4 * H          # FFN intermediate size
VOCAB = 100
MAX_POS = S + 4
DENSE_DIM = 128        # stands in for the original 384
NUM_CLASSES = 3
CLS_PAD = 128          # classifier output padded to a full 128-lane slab
OUT_ROWS = 8           # output sublane padding so stores are dense (8,128) tiles
LN_EPS = 1e-5
NEG_INF = -1e9
VMEM_LIMIT = 32 * 1024 * 1024


def _layernorm(x, g, b):
    mu = jnp.mean(x, axis=-1, keepdims=True)
    var = jnp.mean(jnp.square(x - mu), axis=-1, keepdims=True)
    return (x - mu) * jax.lax.rsqrt(var + LN_EPS) * g + b


# ---------------------------- the fused kernel ----------------------------
def _fused_kernel(
    xemb_ref, mask_ref,
    emb_g_ref, emb_b_ref,
    wq_ref, wk_ref, wv_ref, bq_ref, bk_ref, bv_ref,
    wo_ref, bo_ref, attn_g_ref, attn_b_ref,
    wi_ref, bi_ref, wout_ref, bout_ref, ffn_g_ref, ffn_b_ref,
    wih_ref, blstm_ref,
    hdw_ref, hdb_ref, hpw_ref, hpb_ref,
    dw_ref, db_ref, cw_ref, cb_ref,
    o_ref):
    # ---- embeddings: gathers + add stay in XLA; LayerNorm here ----
    x = _layernorm(xemb_ref[0], emb_g_ref[...], emb_b_ref[...])      # [S,H] f32
    xb = x.astype(jnp.bfloat16)

    # ---- self-attention, head-batched (no per-head loop / concat) ----
    xh = jnp.broadcast_to(xb[None], (N_HEADS, S, H))                  # [NH,S,H]
    q = jnp.einsum("nsh,nhd->nsd", xh, wq_ref[...],
                   preferred_element_type=jnp.float32) + bq_ref[...]  # scale folded
    k = jnp.einsum("nsh,nhd->nsd", xh, wk_ref[...],
                   preferred_element_type=jnp.float32) + bk_ref[...]
    v = jnp.einsum("nsh,nhd->nsd", xh, wv_ref[...],
                   preferred_element_type=jnp.float32) + bv_ref[...]

    s = jnp.einsum("nqd,nkd->nqk", q.astype(jnp.bfloat16),
                   k.astype(jnp.bfloat16),
                   preferred_element_type=jnp.float32)                # [NH,S,S]
    s = s + mask_ref[0]                                               # additive key mask
    s = s - jnp.max(s, axis=-1, keepdims=True)                        # stability
    p = jnp.exp(s)
    p = p * pl.reciprocal(jnp.sum(p, axis=-1, keepdims=True), approx=True)

    ctx = jnp.einsum("nqk,nkd->nqd", p.astype(jnp.bfloat16),
                     v.astype(jnp.bfloat16),
                     preferred_element_type=jnp.float32)              # [NH,S,dH]
    attn = jnp.einsum("nqd,ndh->nqh", ctx.astype(jnp.bfloat16), wo_ref[...],
                      preferred_element_type=jnp.float32)             # [NH,S,H]
    attn = jnp.sum(attn, axis=0) + bo_ref[...]                        # == concat(ctx) @ Wo
    y1 = _layernorm(attn + x, attn_g_ref[...], attn_b_ref[...])       # residual + LN

    # ---- FFN ----
    h1 = jnp.dot(y1.astype(jnp.bfloat16), wi_ref[...],
                 preferred_element_type=jnp.float32) + bi_ref[...]
    # TODO(synk): HF RoBERTa uses exact erf-GELU; tanh-approx GELU used here.
    h1 = jax.nn.gelu(h1, approximate=True)
    y2 = jnp.dot(h1.astype(jnp.bfloat16), wout_ref[...],
                 preferred_element_type=jnp.float32) + bout_ref[...]
    y2 = _layernorm(y2 + y1, ffn_g_ref[...], ffn_b_ref[...])          # encoder out [S,H]

    # ---- LSTM, timestep 0 only (h0=c0=0 -> W_hh term and forget gate are 0) ----
    x0 = y2[0:1, :]                                                   # [1,H]
    gates = jnp.dot(x0.astype(jnp.bfloat16), wih_ref[...],
                    preferred_element_type=jnp.float32) + blstm_ref[...]   # [1,4H]
    i_g = jax.nn.sigmoid(gates[:, 0 * H:1 * H])
    # forget gate skipped: f * c0 == 0 bit-identically
    g_g = jnp.tanh(gates[:, 2 * H:3 * H])
    o_g = jax.nn.sigmoid(gates[:, 3 * H:4 * H])
    c1 = i_g * g_g
    h_lstm = o_g * jnp.tanh(c1)                                       # lstm_out[:,0,:]

    # ---- classification tail (dropouts are identity at inference) ----
    h = jnp.tanh(jnp.dot(h_lstm.astype(jnp.bfloat16), hdw_ref[...],
                         preferred_element_type=jnp.float32) + hdb_ref[...])
    h = jnp.dot(h.astype(jnp.bfloat16), hpw_ref[...],
                preferred_element_type=jnp.float32) + hpb_ref[...]    # head out_proj
    h = jnp.dot(h.astype(jnp.bfloat16), dw_ref[...],
                preferred_element_type=jnp.float32) + db_ref[...]     # dense (->384)
    logits = jnp.dot(h.astype(jnp.bfloat16), cw_ref[...],
                     preferred_element_type=jnp.float32) + cb_ref[...]  # [1,CLS_PAD]
    # dense (8,128) store; wrapper keeps row 0, lanes [:NUM_CLASSES]
    o_ref[0] = jnp.broadcast_to(logits, (OUT_ROWS, CLS_PAD))


def fused_roberta_classifier(x_emb, mask_add, p):
    row = lambda a: a.reshape(1, -1)
    full2 = lambda shape: pl.BlockSpec(shape, lambda b: (0, 0))
    full3 = lambda shape: pl.BlockSpec(shape, lambda b: (0, 0, 0))

    in_specs = [
        pl.BlockSpec((1, S, H), lambda b: (b, 0, 0)),        # embeddings (summed)
        pl.BlockSpec((1, 1, S), lambda b: (b, 0, 0)),        # additive key mask
        full2((1, H)), full2((1, H)),                        # emb LN
        full3((N_HEADS, H, D_HEAD)), full3((N_HEADS, H, D_HEAD)),
        full3((N_HEADS, H, D_HEAD)),                         # Wq/Wk/Wv (head-stacked)
        full3((N_HEADS, 1, D_HEAD)), full3((N_HEADS, 1, D_HEAD)),
        full3((N_HEADS, 1, D_HEAD)),                         # bq/bk/bv
        full3((N_HEADS, D_HEAD, H)), full2((1, H)),          # Wo (head-stacked), bo
        full2((1, H)), full2((1, H)),                        # attn LN
        full2((H, INTER)), full2((1, INTER)),                # FFN inter
        full2((INTER, H)), full2((1, H)),                    # FFN out
        full2((1, H)), full2((1, H)),                        # ffn LN
        full2((H, 4 * H)), full2((1, 4 * H)),                # LSTM W_ih, b
        full2((H, H)), full2((1, H)),                        # head dense
        full2((H, H)), full2((1, H)),                        # head out_proj
        full2((H, DENSE_DIM)), full2((1, DENSE_DIM)),        # dense (->384)
        full2((DENSE_DIM, CLS_PAD)), full2((1, CLS_PAD)),    # classifier (padded)
    ]
    # TODO(synk): at real scale, mark the grid-invariant weight specs
    # pipeline_mode=pl.Buffered(1) to single-buffer them (v7x 64 MiB VMEM).
    return pl.pallas_call(
        _fused_kernel,
        grid=(B,),
        in_specs=in_specs,
        out_specs=pl.BlockSpec((1, OUT_ROWS, CLS_PAD), lambda b: (b, 0, 0)),
        out_shape=jax.ShapeDtypeStruct((B, OUT_ROWS, CLS_PAD), jnp.float32),
        compiler_params=pltpu.CompilerParams(
            dimension_semantics=("parallel",), vmem_limit_bytes=VMEM_LIMIT),
    )(x_emb, mask_add,
      row(p["emb_ln_g"]), row(p["emb_ln_b"]),
      p["wq_h"], p["wk_h"], p["wv_h"], p["bq_h"], p["bk_h"], p["bv_h"],
      p["wo_h"], row(p["bo"]),
      row(p["attn_ln_g"]), row(p["attn_ln_b"]),
      p["w_inter"], row(p["b_inter"]), p["w_out"], row(p["b_out"]),
      row(p["ffn_ln_g"]), row(p["ffn_ln_b"]),
      p["w_ih"], row(p["b_lstm"]),
      p["head_dense_w"], row(p["head_dense_b"]),
      p["head_proj_w"], row(p["head_proj_b"]),
      p["dense_w"], row(p["dense_b"]),
      p["cls_w_pad"], row(p["cls_b_pad"]))


# ----------------- parameters (deterministic, synthetic) -----------------
def init_params(key):
    def w_init(k, shape, scale=0.02):
        return jax.random.normal(k, shape, jnp.float32) * scale

    ks = jax.random.split(key, 32)
    p = {}
    p["word_emb"] = w_init(ks[0], (VOCAB, H))
    p["pos_emb"] = w_init(ks[1], (MAX_POS, H))
    p["type_emb"] = w_init(ks[2], (2, H))
    p["emb_ln_g"] = jnp.ones((H,), jnp.float32)
    p["emb_ln_b"] = jnp.zeros((H,), jnp.float32)

    # attention: 1/sqrt(D_HEAD) folded into the Q projection at init time;
    # weights pre-stacked per head ([NH, H, dH] / [NH, dH, H]) so the kernel
    # uses batch-leading dot_generals with no in-kernel transposes.
    scale = 1.0 / (D_HEAD ** 0.5)
    wq = w_init(ks[3], (H, H)) * scale
    wk = w_init(ks[4], (H, H))
    wv = w_init(ks[5], (H, H))
    bq = w_init(ks[6], (H,)) * scale
    bk = w_init(ks[7], (H,))
    bv = w_init(ks[8], (H,))
    heads_w = lambda w: jnp.transpose(w.reshape(H, N_HEADS, D_HEAD), (1, 0, 2))
    heads_b = lambda b: b.reshape(N_HEADS, 1, D_HEAD)
    p["wq_h"] = heads_w(wq).astype(jnp.bfloat16)
    p["wk_h"] = heads_w(wk).astype(jnp.bfloat16)
    p["wv_h"] = heads_w(wv).astype(jnp.bfloat16)
    p["bq_h"] = heads_b(bq)
    p["bk_h"] = heads_b(bk)
    p["bv_h"] = heads_b(bv)
    wo = w_init(ks[9], (H, H))
    p["wo_h"] = wo.reshape(N_HEADS, D_HEAD, H).astype(jnp.bfloat16)
    p["bo"] = w_init(ks[10], (H,))
    p["attn_ln_g"] = jnp.ones((H,), jnp.float32)
    p["attn_ln_b"] = jnp.zeros((H,), jnp.float32)

    p["w_inter"] = w_init(ks[11], (H, INTER)).astype(jnp.bfloat16)
    p["b_inter"] = w_init(ks[12], (INTER,))
    p["w_out"] = w_init(ks[13], (INTER, H)).astype(jnp.bfloat16)
    p["b_out"] = w_init(ks[14], (H,))
    p["ffn_ln_g"] = jnp.ones((H,), jnp.float32)
    p["ffn_ln_b"] = jnp.zeros((H,), jnp.float32)

    # LSTM (weights pre-transposed to [in, 4H]); gate order i, f, g, o.
    # bias = b_ih + b_hh pre-summed.  W_hh is kept only for fidelity: only
    # lstm_out[:,0,:] is consumed and h0 = 0, so its contribution is exactly 0.
    p["w_ih"] = w_init(ks[15], (H, 4 * H)).astype(jnp.bfloat16)
    p["w_hh"] = w_init(ks[16], (H, 4 * H)).astype(jnp.bfloat16)   # unused (== 0 term)
    p["b_lstm"] = w_init(ks[17], (4 * H,)) + w_init(ks[18], (4 * H,))

    # RoBERTa classification head.  NOTE: modeled as dense(H->H)+tanh followed
    # by out_proj(H->H) so the original H -> 384 -> num_classes chain is valid.
    p["head_dense_w"] = w_init(ks[19], (H, H)).astype(jnp.bfloat16)
    p["head_dense_b"] = w_init(ks[20], (H,))
    p["head_proj_w"] = w_init(ks[21], (H, H)).astype(jnp.bfloat16)
    p["head_proj_b"] = w_init(ks[22], (H,))

    # Extra layers of RobertaClassifier; classifier padded to 128 lanes.
    p["dense_w"] = w_init(ks[23], (H, DENSE_DIM)).astype(jnp.bfloat16)
    p["dense_b"] = w_init(ks[24], (DENSE_DIM,))
    cls_w = w_init(ks[25], (DENSE_DIM, NUM_CLASSES))
    cls_b = w_init(ks[26], (NUM_CLASSES,))
    p["cls_w_pad"] = jnp.pad(
        cls_w, ((0, 0), (0, CLS_PAD - NUM_CLASSES))).astype(jnp.bfloat16)
    p["cls_b_pad"] = jnp.pad(cls_b, (0, CLS_PAD - NUM_CLASSES))
    return p


# ----------------- forward pass -----------------
def roberta_classifier_forward(params, input_ids, attention_mask):
    mask_f = attention_mask.astype(jnp.float32)

    # Embedding gathers are XLA glue (they fuse with the add); everything from
    # the embedding LayerNorm through the classifier runs in ONE Pallas kernel.
    # TODO(synk): at real scale gather embedding rows in-kernel via
    # PrefetchScalarGridSpec scalar prefetch + pl.Element row BlockSpecs.
    pad_idx = 1
    pos_ids = jnp.cumsum(attention_mask, axis=1) * attention_mask + pad_idx
    x_emb = (params["word_emb"][input_ids]
             + params["pos_emb"][pos_ids]
             + params["type_emb"][0])                          # [B,S,H] f32
    mask_add = ((1.0 - mask_f) * NEG_INF)[:, None, :]           # [B,1,S]

    out_pad = fused_roberta_classifier(x_emb, mask_add, params)  # [B,8,CLS_PAD]
    return out_pad[:, 0, :NUM_CLASSES]


if __name__ == "__main__":
    key = jax.random.PRNGKey(0)
    pkey, ikey = jax.random.split(key)
    params = init_params(pkey)

    input_ids = jax.random.randint(ikey, (B, S), 2, VOCAB, dtype=jnp.int32)
    attention_mask = jnp.ones((B, S), dtype=jnp.int32)

    logits = jax.jit(roberta_classifier_forward)(params, input_ids, attention_mask)
    jax.block_until_ready(logits)
    assert logits.shape == (B, NUM_CLASSES), logits.shape
    assert bool(jnp.all(jnp.isfinite(logits)))
    print("KERNEL_OK")
</pallas_src>

<mosaic_0001>
module attributes {stable_mosaic.version = 11 : i64} {
  func.func @_fused_kernel(%arg0: i32, %arg1: memref<1x8x128xf32, #tpu.memory_space<vmem>>, %arg2: memref<1x1x8xf32, #tpu.memory_space<vmem>>, %arg3: memref<1x128xf32, #tpu.memory_space<vmem>>, %arg4: memref<1x128xf32, #tpu.memory_space<vmem>>, %arg5: memref<4x128x32xbf16, #tpu.memory_space<vmem>>, %arg6: memref<4x128x32xbf16, #tpu.memory_space<vmem>>, %arg7: memref<4x128x32xbf16, #tpu.memory_space<vmem>>, %arg8: memref<4x1x32xf32, #tpu.memory_space<vmem>>, %arg9: memref<4x1x32xf32, #tpu.memory_space<vmem>>, %arg10: memref<4x1x32xf32, #tpu.memory_space<vmem>>, %arg11: memref<4x32x128xbf16, #tpu.memory_space<vmem>>, %arg12: memref<1x128xf32, #tpu.memory_space<vmem>>, %arg13: memref<1x128xf32, #tpu.memory_space<vmem>>, %arg14: memref<1x128xf32, #tpu.memory_space<vmem>>, %arg15: memref<128x512xbf16, #tpu.memory_space<vmem>>, %arg16: memref<1x512xf32, #tpu.memory_space<vmem>>, %arg17: memref<512x128xbf16, #tpu.memory_space<vmem>>, %arg18: memref<1x128xf32, #tpu.memory_space<vmem>>, %arg19: memref<1x128xf32, #tpu.memory_space<vmem>>, %arg20: memref<1x128xf32, #tpu.memory_space<vmem>>, %arg21: memref<128x512xbf16, #tpu.memory_space<vmem>>, %arg22: memref<1x512xf32, #tpu.memory_space<vmem>>, %arg23: memref<128x128xbf16, #tpu.memory_space<vmem>>, %arg24: memref<1x128xf32, #tpu.memory_space<vmem>>, %arg25: memref<128x128xbf16, #tpu.memory_space<vmem>>, %arg26: memref<1x128xf32, #tpu.memory_space<vmem>>, %arg27: memref<128x128xbf16, #tpu.memory_space<vmem>>, %arg28: memref<1x128xf32, #tpu.memory_space<vmem>>, %arg29: memref<128x128xbf16, #tpu.memory_space<vmem>>, %arg30: memref<1x128xf32, #tpu.memory_space<vmem>>, %arg31: memref<1x8x128xf32, #tpu.memory_space<vmem>>) attributes {dimension_semantics = [#tpu.dimension_semantics<parallel>], iteration_bounds = array<i64: 2>, scalar_prefetch = 0 : i64, scratch_operands = 0 : i64, tpu.core_type = #tpu.core_type<tc>, window_params = [{transform_indices = @transform_0, window_bounds = array<i64: 1, 8, 128>}, {transform_indices = @transform_1, window_bounds = array<i64: 1, 1, 8>}, {pipeline_mode = #tpu.pipeline_mode<synchronous>, transform_indices = @transform_2, window_bounds = array<i64: 1, 128>}, {pipeline_mode = #tpu.pipeline_mode<synchronous>, transform_indices = @transform_3, window_bounds = array<i64: 1, 128>}, {pipeline_mode = #tpu.pipeline_mode<synchronous>, transform_indices = @transform_4, window_bounds = array<i64: 4, 128, 32>}, {pipeline_mode = #tpu.pipeline_mode<synchronous>, transform_indices = @transform_5, window_bounds = array<i64: 4, 128, 32>}, {pipeline_mode = #tpu.pipeline_mode<synchronous>, transform_indices = @transform_6, window_bounds = array<i64: 4, 128, 32>}, {pipeline_mode = #tpu.pipeline_mode<synchronous>, transform_indices = @transform_7, window_bounds = array<i64: 4, 1, 32>}, {pipeline_mode = #tpu.pipeline_mode<synchronous>, transform_indices = @transform_8, window_bounds = array<i64: 4, 1, 32>}, {pipeline_mode = #tpu.pipeline_mode<synchronous>, transform_indices = @transform_9, window_bounds = array<i64: 4, 1, 32>}, {pipeline_mode = #tpu.pipeline_mode<synchronous>, transform_indices = @transform_10, window_bounds = array<i64: 4, 32, 128>}, {pipeline_mode = #tpu.pipeline_mode<synchronous>, transform_indices = @transform_11, window_bounds = array<i64: 1, 128>}, {pipeline_mode = #tpu.pipeline_mode<synchronous>, transform_indices = @transform_12, window_bounds = array<i64: 1, 128>}, {pipeline_mode = #tpu.pipeline_mode<synchronous>, transform_indices = @transform_13, window_bounds = array<i64: 1, 128>}, {pipeline_mode = #tpu.pipeline_mode<synchronous>, transform_indices = @transform_14, window_bounds = array<i64: 128, 512>}, {pipeline_mode = #tpu.pipeline_mode<synchronous>, transform_indices = @transform_15, window_bounds = array<i64: 1, 512>}, {pipeline_mode = #tpu.pipeline_mode<synchronous>, transform_indices = @transform_16, window_bounds = array<i64: 512, 128>}, {pipeline_mode = #tpu.pipeline_mode<synchronous>, transform_indices = @transform_17, window_bounds = array<i64: 1, 128>}, {pipeline_mode = #tpu.pipeline_mode<synchronous>, transform_indices = @transform_18, window_bounds = array<i64: 1, 128>}, {pipeline_mode = #tpu.pipeline_mode<synchronous>, transform_indices = @transform_19, window_bounds = array<i64: 1, 128>}, {pipeline_mode = #tpu.pipeline_mode<synchronous>, transform_indices = @transform_20, window_bounds = array<i64: 128, 512>}, {pipeline_mode = #tpu.pipeline_mode<synchronous>, transform_indices = @transform_21, window_bounds = array<i64: 1, 512>}, {pipeline_mode = #tpu.pipeline_mode<synchronous>, transform_indices = @transform_22, window_bounds = array<i64: 128, 128>}, {pipeline_mode = #tpu.pipeline_mode<synchronous>, transform_indices = @transform_23, window_bounds = array<i64: 1, 128>}, {pipeline_mode = #tpu.pipeline_mode<synchronous>, transform_indices = @transform_24, window_bounds = array<i64: 128, 128>}, {pipeline_mode = #tpu.pipeline_mode<synchronous>, transform_indices = @transform_25, window_bounds = array<i64: 1, 128>}, {pipeline_mode = #tpu.pipeline_mode<synchronous>, transform_indices = @transform_26, window_bounds = array<i64: 128, 128>}, {pipeline_mode = #tpu.pipeline_mode<synchronous>, transform_indices = @transform_27, window_bounds = array<i64: 1, 128>}, {pipeline_mode = #tpu.pipeline_mode<synchronous>, transform_indices = @transform_28, window_bounds = array<i64: 128, 128>}, {pipeline_mode = #tpu.pipeline_mode<synchronous>, transform_indices = @transform_29, window_bounds = array<i64: 1, 128>}, {transform_indices = @transform_30, window_bounds = array<i64: 1, 8, 128>}]} {
    %c0 = arith.constant 0 : index
    %c0_0 = arith.constant 0 : index
    %c0_1 = arith.constant 0 : index
    %0 = vector.load %arg1[%c0, %c0_0, %c0_1] : memref<1x8x128xf32, #tpu.memory_space<vmem>>, vector<1x8x128xf32>
    %1 = vector.shape_cast %0 : vector<1x8x128xf32> to vector<8x128xf32>
    %c0_2 = arith.constant 0 : index
    %c0_3 = arith.constant 0 : index
    %2 = vector.load %arg3[%c0_2, %c0_3] : memref<1x128xf32, #tpu.memory_space<vmem>>, vector<1x128xf32>
    %c0_4 = arith.constant 0 : index
    %c0_5 = arith.constant 0 : index
    %3 = vector.load %arg4[%c0_4, %c0_5] : memref<1x128xf32, #tpu.memory_space<vmem>>, vector<1x128xf32>
    %cst = arith.constant dense<0.000000e+00> : vector<8xf32>
    %4 = vector.multi_reduction <add>, %1, %cst [1] : vector<8x128xf32> to vector<8xf32>
    %5 = vector.shape_cast %4 : vector<8xf32> to vector<8x1xf32>
    %cst_6 = arith.constant 1.280000e+02 : f32
    %6 = vector.broadcast %cst_6 : f32 to vector<8x1xf32>
    %7 = arith.divf %5, %6 : vector<8x1xf32>
    %8 = vector.broadcast %7 : vector<8x1xf32> to vector<8x128xf32>
    %9 = arith.subf %1, %8 : vector<8x128xf32>
    %10 = arith.mulf %9, %9 : vector<8x128xf32>
    %cst_7 = arith.constant dense<0.000000e+00> : vector<8xf32>
    %11 = vector.multi_reduction <add>, %10, %cst_7 [1] : vector<8x128xf32> to vector<8xf32>
    %12 = vector.shape_cast %11 : vector<8xf32> to vector<8x1xf32>
    %cst_8 = arith.constant 1.280000e+02 : f32
    %13 = vector.broadcast %cst_8 : f32 to vector<8x1xf32>
    %14 = arith.divf %12, %13 : vector<8x1xf32>
    %15 = vector.broadcast %7 : vector<8x1xf32> to vector<8x128xf32>
    %16 = arith.subf %1, %15 : vector<8x128xf32>
    %cst_9 = arith.constant 9.99999974E-6 : f32
    %17 = vector.broadcast %cst_9 : f32 to vector<8x1xf32>
    %18 = arith.addf %14, %17 : vector<8x1xf32>
    %19 = math.rsqrt %18 : vector<8x1xf32>
    %20 = vector.broadcast %19 : vector<8x1xf32> to vector<8x128xf32>
    %21 = arith.mulf %16, %20 : vector<8x128xf32>
    %22 = vector.broadcast %2 : vector<1x128xf32> to vector<8x128xf32>
    %23 = arith.mulf %21, %22 : vector<8x128xf32>
    %24 = vector.broadcast %3 : vector<1x128xf32> to vector<8x128xf32>
    %25 = arith.addf %23, %24 : vector<8x128xf32>
    %26 = arith.truncf %25 : vector<8x128xf32> to vector<8x128xbf16>
    %27 = vector.shape_cast %26 : vector<8x128xbf16> to vector<1x8x128xbf16>
    %28 = vector.shape_cast %27 : vector<1x8x128xbf16> to vector<1x8x128xbf16>
    %29 = vector.broadcast %28 : vector<1x8x128xbf16> to vector<4x8x128xbf16>
    %c0_10 = arith.constant 0 : index
    %c0_11 = arith.constant 0 : index
    %c0_12 = arith.constant 0 : index
    %30 = vector.load %arg5[%c0_10, %c0_11, %c0_12] : memref<4x128x32xbf16, #tpu.memory_space<vmem>>, vector<4x128x32xbf16>
    "tpu.trace_start"() <{level = 10 : i32, message = "nsh,nhd->nsd"}> : () -> ()
    %cst_13 = arith.constant dense<0.000000e+00> : vector<4x8x32xf32>
    %31 = tpu.matmul %29, %30, %cst_13 {dimension_numbers = #tpu.dot_dimension_numbers<[2], [1], [1], [2], [0, 0, 0, 1, 1, 2], [0], [0]>} : vector<4x8x128xbf16>, vector<4x128x32xbf16>, vector<4x8x32xf32> -> vector<4x8x32xf32>
    "tpu.trace_stop"() : () -> ()
    %c0_14 = arith.constant 0 : index
    %c0_15 = arith.constant 0 : index
    %c0_16 = arith.constant 0 : index
    %32 = vector.load %arg8[%c0_14, %c0_15, %c0_16] : memref<4x1x32xf32, #tpu.memory_space<vmem>>, vector<4x1x32xf32>
    %33 = vector.broadcast %32 : vector<4x1x32xf32> to vector<4x8x32xf32>
    %34 = arith.addf %31, %33 : vector<4x8x32xf32>
    %c0_17 = arith.constant 0 : index
    %c0_18 = arith.constant 0 : index
    %c0_19 = arith.constant 0 : index
    %35 = vector.load %arg6[%c0_17, %c0_18, %c0_19] : memref<4x128x32xbf16, #tpu.memory_space<vmem>>, vector<4x128x32xbf16>
    "tpu.trace_start"() <{level = 10 : i32, message = "nsh,nhd->nsd"}> : () -> ()
    %cst_20 = arith.constant dense<0.000000e+00> : vector<4x8x32xf32>
    %36 = tpu.matmul %29, %35, %cst_20 {dimension_numbers = #tpu.dot_dimension_numbers<[2], [1], [1], [2], [0, 0, 0, 1, 1, 2], [0], [0]>} : vector<4x8x128xbf16>, vector<4x128x32xbf16>, vector<4x8x32xf32> -> vector<4x8x32xf32>
    "tpu.trace_stop"() : () -> ()
    %c0_21 = arith.constant 0 : index
    %c0_22 = arith.constant 0 : index
    %c0_23 = arith.constant 0 : index
    %37 = vector.load %arg9[%c0_21, %c0_22, %c0_23] : memref<4x1x32xf32, #tpu.memory_space<vmem>>, vector<4x1x32xf32>
    %38 = vector.broadcast %37 : vector<4x1x32xf32> to vector<4x8x32xf32>
    %39 = arith.addf %36, %38 : vector<4x8x32xf32>
    %c0_24 = arith.constant 0 : index
    %c0_25 = arith.constant 0 : index
    %c0_26 = arith.constant 0 : index
    %40 = vector.load %arg7[%c0_24, %c0_25, %c0_26] : memref<4x128x32xbf16, #tpu.memory_space<vmem>>, vector<4x128x32xbf16>
    "tpu.trace_start"() <{level = 10 : i32, message = "nsh,nhd->nsd"}> : () -> ()
    %cst_27 = arith.constant dense<0.000000e+00> : vector<4x8x32xf32>
    %41 = tpu.matmul %29, %40, %cst_27 {dimension_numbers = #tpu.dot_dimension_numbers<[2], [1], [1], [2], [0, 0, 0, 1, 1, 2], [0], [0]>} : vector<4x8x128xbf16>, vector<4x128x32xbf16>, vector<4x8x32xf32> -> vector<4x8x32xf32>
    "tpu.trace_stop"() : () -> ()
    %c0_28 = arith.constant 0 : index
    %c0_29 = arith.constant 0 : index
    %c0_30 = arith.constant 0 : index
    %42 = vector.load %arg10[%c0_28, %c0_29, %c0_30] : memref<4x1x32xf32, #tpu.memory_space<vmem>>, vector<4x1x32xf32>
    %43 = vector.broadcast %42 : vector<4x1x32xf32> to vector<4x8x32xf32>
    %44 = arith.addf %41, %43 : vector<4x8x32xf32>
    %45 = arith.truncf %34 : vector<4x8x32xf32> to vector<4x8x32xbf16>
    %46 = arith.truncf %39 : vector<4x8x32xf32> to vector<4x8x32xbf16>
    "tpu.trace_start"() <{level = 10 : i32, message = "nqd,nkd->nqk"}> : () -> ()
    %cst_31 = arith.constant dense<0.000000e+00> : vector<4x8x8xf32>
    %47 = tpu.matmul %45, %46, %cst_31 {dimension_numbers = #tpu.dot_dimension_numbers<[2], [2], [1], [1], [0, 0, 0, 1, 1, 1], [0], [0]>} : vector<4x8x32xbf16>, vector<4x8x32xbf16>, vector<4x8x8xf32> -> vector<4x8x8xf32>
    "tpu.trace_stop"() : () -> ()
    %c0_32 = arith.constant 0 : index
    %c0_33 = arith.constant 0 : index
    %c0_34 = arith.constant 0 : index
    %48 = vector.load %arg2[%c0_32, %c0_33, %c0_34] : memref<1x1x8xf32, #tpu.memory_space<vmem>>, vector<1x1x8xf32>
    %49 = vector.shape_cast %48 : vector<1x1x8xf32> to vector<1x8xf32>
    %50 = vector.shape_cast %49 : vector<1x8xf32> to vector<1x1x8xf32>
    %51 = vector.broadcast %50 : vector<1x1x8xf32> to vector<4x8x8xf32>
    %52 = arith.addf %47, %51 : vector<4x8x8xf32>
    %cst_35 = arith.constant dense<0xFF800000> : vector<4x8xf32>
    %53 = vector.multi_reduction <maximumf>, %52, %cst_35 [2] : vector<4x8x8xf32> to vector<4x8xf32>
    %54 = vector.shape_cast %53 : vector<4x8xf32> to vector<4x8x1xf32>
    %55 = vector.broadcast %54 : vector<4x8x1xf32> to vector<4x8x8xf32>
    %56 = arith.subf %52, %55 : vector<4x8x8xf32>
    %57 = math.exp %56 : vector<4x8x8xf32>
    %cst_36 = arith.constant dense<0.000000e+00> : vector<4x8xf32>
    %58 = vector.multi_reduction <add>, %57, %cst_36 [2] : vector<4x8x8xf32> to vector<4x8xf32>
    %59 = vector.shape_cast %58 : vector<4x8xf32> to vector<4x8x1xf32>
    %60 = tpu.reciprocal %59 {approx = true} : vector<4x8x1xf32> -> vector<4x8x1xf32>
    %61 = vector.broadcast %60 : vector<4x8x1xf32> to vector<4x8x8xf32>
    %62 = arith.mulf %57, %61 : vector<4x8x8xf32>
    %63 = arith.truncf %62 : vector<4x8x8xf32> to vector<4x8x8xbf16>
    %64 = arith.truncf %44 : vector<4x8x32xf32> to vector<4x8x32xbf16>
    "tpu.trace_start"() <{level = 10 : i32, message = "nqk,nkd->nqd"}> : () -> ()
    %cst_37 = arith.constant dense<0.000000e+00> : vector<4x8x32xf32>
    %65 = tpu.matmul %63, %64, %cst_37 {dimension_numbers = #tpu.dot_dimension_numbers<[2], [1], [1], [2], [0, 0, 0, 1, 1, 2], [0], [0]>} : vector<4x8x8xbf16>, vector<4x8x32xbf16>, vector<4x8x32xf32> -> vector<4x8x32xf32>
    "tpu.trace_stop"() : () -> ()
    %66 = arith.truncf %65 : vector<4x8x32xf32> to vector<4x8x32xbf16>
    %c0_38 = arith.constant 0 : index
    %c0_39 = arith.constant 0 : index
    %c0_40 = arith.constant 0 : index
    %67 = vector.load %arg11[%c0_38, %c0_39, %c0_40] : memref<4x32x128xbf16, #tpu.memory_space<vmem>>, vector<4x32x128xbf16>
    "tpu.trace_start"() <{level = 10 : i32, message = "nqd,ndh->nqh"}> : () -> ()
    %cst_41 = arith.constant dense<0.000000e+00> : vector<4x8x128xf32>
    %68 = tpu.matmul %66, %67, %cst_41 {dimension_numbers = #tpu.dot_dimension_numbers<[2], [1], [1], [2], [0, 0, 0, 1, 1, 2], [0], [0]>} : vector<4x8x32xbf16>, vector<4x32x128xbf16>, vector<4x8x128xf32> -> vector<4x8x128xf32>
    "tpu.trace_stop"() : () -> ()
    %cst_42 = arith.constant dense<0.000000e+00> : vector<8x128xf32>
    %69 = vector.multi_reduction <add>, %68, %cst_42 [0] : vector<4x8x128xf32> to vector<8x128xf32>
    %c0_43 = arith.constant 0 : index
    %c0_44 = arith.constant 0 : index
    %70 = vector.load %arg12[%c0_43, %c0_44] : memref<1x128xf32, #tpu.memory_space<vmem>>, vector<1x128xf32>
    %71 = vector.broadcast %70 : vector<1x128xf32> to vector<8x128xf32>
    %72 = arith.addf %69, %71 : vector<8x128xf32>
    %73 = arith.addf %72, %25 : vector<8x128xf32>
    %c0_45 = arith.constant 0 : index
    %c0_46 = arith.constant 0 : index
    %74 = vector.load %arg13[%c0_45, %c0_46] : memref<1x128xf32, #tpu.memory_space<vmem>>, vector<1x128xf32>
    %c0_47 = arith.constant 0 : index
    %c0_48 = arith.constant 0 : index
    %75 = vector.load %arg14[%c0_47, %c0_48] : memref<1x128xf32, #tpu.memory_space<vmem>>, vector<1x128xf32>
    %cst_49 = arith.constant dense<0.000000e+00> : vector<8xf32>
    %76 = vector.multi_reduction <add>, %73, %cst_49 [1] : vector<8x128xf32> to vector<8xf32>
    %77 = vector.shape_cast %76 : vector<8xf32> to vector<8x1xf32>
    %cst_50 = arith.constant 1.280000e+02 : f32
    %78 = vector.broadcast %cst_50 : f32 to vector<8x1xf32>
    %79 = arith.divf %77, %78 : vector<8x1xf32>
    %80 = vector.broadcast %79 : vector<8x1xf32> to vector<8x128xf32>
    %81 = arith.subf %73, %80 : vector<8x128xf32>
    %82 = arith.mulf %81, %81 : vector<8x128xf32>
    %cst_51 = arith.constant dense<0.000000e+00> : vector<8xf32>
    %83 = vector.multi_reduction <add>, %82, %cst_51 [1] : vector<8x128xf32> to vector<8xf32>
    %84 = vector.shape_cast %83 : vector<8xf32> to vector<8x1xf32>
    %cst_52 = arith.constant 1.280000e+02 : f32
    %85 = vector.broadcast %cst_52 : f32 to vector<8x1xf32>
    %86 = arith.divf %84, %85 : vector<8x1xf32>
    %87 = vector.broadcast %79 : vector<8x1xf32> to vector<8x128xf32>
    %88 = arith.subf %73, %87 : vector<8x128xf32>
    %cst_53 = arith.constant 9.99999974E-6 : f32
    %89 = vector.broadcast %cst_53 : f32 to vector<8x1xf32>
    %90 = arith.addf %86, %89 : vector<8x1xf32>
    %91 = math.rsqrt %90 : vector<8x1xf32>
    %92 = vector.broadcast %91 : vector<8x1xf32> to vector<8x128xf32>
    %93 = arith.mulf %88, %92 : vector<8x128xf32>
    %94 = vector.broadcast %74 : vector<1x128xf32> to vector<8x128xf32>
    %95 = arith.mulf %93, %94 : vector<8x128xf32>
    %96 = vector.broadcast %75 : vector<1x128xf32> to vector<8x128xf32>
    %97 = arith.addf %95, %96 : vector<8x128xf32>
    %98 = arith.truncf %97 : vector<8x128xf32> to vector<8x128xbf16>
    %c0_54 = arith.constant 0 : index
    %c0_55 = arith.constant 0 : index
    %99 = vector.load %arg15[%c0_54, %c0_55] : memref<128x512xbf16, #tpu.memory_space<vmem>>, vector<128x512xbf16>
    %cst_56 = arith.constant dense<0.000000e+00> : vector<8x512xf32>
    %100 = tpu.matmul %98, %99, %cst_56 {dimension_numbers = #tpu.dot_dimension_numbers<[1], [0], [0], [1], [0, 0, 1, 1], [], []>} : vector<8x128xbf16>, vector<128x512xbf16>, vector<8x512xf32> -> vector<8x512xf32>
    %c0_57 = arith.constant 0 : index
    %c0_58 = arith.constant 0 : index
    %101 = vector.load %arg16[%c0_57, %c0_58] : memref<1x512xf32, #tpu.memory_space<vmem>>, vector<1x512xf32>
    %102 = vector.broadcast %101 : vector<1x512xf32> to vector<8x512xf32>
    %103 = arith.addf %100, %102 : vector<8x512xf32>
    %104 = arith.mulf %103, %103 : vector<8x512xf32>
    %105 = arith.mulf %103, %104 : vector<8x512xf32>
    %cst_59 = arith.constant 4.471500e-02 : f32
    %106 = vector.broadcast %cst_59 : f32 to vector<8x512xf32>
    %107 = arith.mulf %106, %105 : vector<8x512xf32>
    %108 = arith.addf %103, %107 : vector<8x512xf32>
    %cst_60 = arith.constant 0.797884583 : f32
    %109 = vector.broadcast %cst_60 : f32 to vector<8x512xf32>
    %110 = arith.mulf %109, %108 : vector<8x512xf32>
    %111 = math.tanh %110 : vector<8x512xf32>
    %cst_61 = arith.constant 1.000000e+00 : f32
    %112 = vector.broadcast %cst_61 : f32 to vector<8x512xf32>
    %113 = arith.addf %112, %111 : vector<8x512xf32>
    %cst_62 = arith.constant 5.000000e-01 : f32
    %114 = vector.broadcast %cst_62 : f32 to vector<8x512xf32>
    %115 = arith.mulf %114, %113 : vector<8x512xf32>
    %116 = arith.mulf %103, %115 : vector<8x512xf32>
    %117 = arith.truncf %116 : vector<8x512xf32> to vector<8x512xbf16>
    %c0_63 = arith.constant 0 : index
    %c0_64 = arith.constant 0 : index
    %118 = vector.load %arg17[%c0_63, %c0_64] : memref<512x128xbf16, #tpu.memory_space<vmem>>, vector<512x128xbf16>
    %cst_65 = arith.constant dense<0.000000e+00> : vector<8x128xf32>
    %119 = tpu.matmul %117, %118, %cst_65 {dimension_numbers = #tpu.dot_dimension_numbers<[1], [0], [0], [1], [0, 0, 1, 1], [], []>} : vector<8x512xbf16>, vector<512x128xbf16>, vector<8x128xf32> -> vector<8x128xf32>
    %c0_66 = arith.constant 0 : index
    %c0_67 = arith.constant 0 : index
    %120 = vector.load %arg18[%c0_66, %c0_67] : memref<1x128xf32, #tpu.memory_space<vmem>>, vector<1x128xf32>
    %121 = vector.broadcast %120 : vector<1x128xf32> to vector<8x128xf32>
    %122 = arith.addf %119, %121 : vector<8x128xf32>
    %123 = arith.addf %122, %97 : vector<8x128xf32>
    %c0_68 = arith.constant 0 : index
    %c0_69 = arith.constant 0 : index
    %124 = vector.load %arg19[%c0_68, %c0_69] : memref<1x128xf32, #tpu.memory_space<vmem>>, vector<1x128xf32>
    %c0_70 = arith.constant 0 : index
    %c0_71 = arith.constant 0 : index
    %125 = vector.load %arg20[%c0_70, %c0_71] : memref<1x128xf32, #tpu.memory_space<vmem>>, vector<1x128xf32>
    %cst_72 = arith.constant dense<0.000000e+00> : vector<8xf32>
    %126 = vector.multi_reduction <add>, %123, %cst_72 [1] : vector<8x128xf32> to vector<8xf32>
    %127 = vector.shape_cast %126 : vector<8xf32> to vector<8x1xf32>
    %cst_73 = arith.constant 1.280000e+02 : f32
    %128 = vector.broadcast %cst_73 : f32 to vector<8x1xf32>
    %129 = arith.divf %127, %128 : vector<8x1xf32>
    %130 = vector.broadcast %129 : vector<8x1xf32> to vector<8x128xf32>
    %131 = arith.subf %123, %130 : vector<8x128xf32>
    %132 = arith.mulf %131, %131 : vector<8x128xf32>
    %cst_74 = arith.constant dense<0.000000e+00> : vector<8xf32>
    %133 = vector.multi_reduction <add>, %132, %cst_74 [1] : vector<8x128xf32> to vector<8xf32>
    %134 = vector.shape_cast %133 : vector<8xf32> to vector<8x1xf32>
    %cst_75 = arith.constant 1.280000e+02 : f32
    %135 = vector.broadcast %cst_75 : f32 to vector<8x1xf32>
    %136 = arith.divf %134, %135 : vector<8x1xf32>
    %137 = vector.broadcast %129 : vector<8x1xf32> to vector<8x128xf32>
    %138 = arith.subf %123, %137 : vector<8x128xf32>
    %cst_76 = arith.constant 9.99999974E-6 : f32
    %139 = vector.broadcast %cst_76 : f32 to vector<8x1xf32>
    %140 = arith.addf %136, %139 : vector<8x1xf32>
    %141 = math.rsqrt %140 : vector<8x1xf32>
    %142 = vector.broadcast %141 : vector<8x1xf32> to vector<8x128xf32>
    %143 = arith.mulf %138, %142 : vector<8x128xf32>
    %144 = vector.broadcast %124 : vector<1x128xf32> to vector<8x128xf32>
    %145 = arith.mulf %143, %144 : vector<8x128xf32>
    %146 = vector.broadcast %125 : vector<1x128xf32> to vector<8x128xf32>
    %147 = arith.addf %145, %146 : vector<8x128xf32>
    %148 = vector.extract_strided_slice %147 {offsets = [0, 0], sizes = [1, 128], strides = [1, 1]} : vector<8x128xf32> to vector<1x128xf32>
    %149 = arith.truncf %148 : vector<1x128xf32> to vector<1x128xbf16>
    %c0_77 = arith.constant 0 : index
    %c0_78 = arith.constant 0 : index
    %150 = vector.load %arg21[%c0_77, %c0_78] : memref<128x512xbf16, #tpu.memory_space<vmem>>, vector<128x512xbf16>
    %cst_79 = arith.constant dense<0.000000e+00> : vector<1x512xf32>
    %151 = tpu.matmul %149, %150, %cst_79 {dimension_numbers = #tpu.dot_dimension_numbers<[1], [0], [0], [1], [0, 0, 1, 1], [], []>} : vector<1x128xbf16>, vector<128x512xbf16>, vector<1x512xf32> -> vector<1x512xf32>
    %c0_80 = arith.constant 0 : index
    %c0_81 = arith.constant 0 : index
    %152 = vector.load %arg22[%c0_80, %c0_81] : memref<1x512xf32, #tpu.memory_space<vmem>>, vector<1x512xf32>
    %153 = arith.addf %151, %152 : vector<1x512xf32>
    %154 = vector.extract_strided_slice %153 {offsets = [0, 0], sizes = [1, 128], strides = [1, 1]} : vector<1x512xf32> to vector<1x128xf32>
    %155 = arith.negf %154 : vector<1x128xf32>
    %156 = math.exp %155 : vector<1x128xf32>
    %cst_82 = arith.constant 1.000000e+00 : f32
    %157 = vector.broadcast %cst_82 : f32 to vector<1x128xf32>
    %158 = arith.addf %157, %156 : vector<1x128xf32>
    %159 = arith.divf %157, %158 : vector<1x128xf32>
    %160 = vector.extract_strided_slice %153 {offsets = [0, 256], sizes = [1, 128], strides = [1, 1]} : vector<1x512xf32> to vector<1x128xf32>
    %161 = math.tanh %160 : vector<1x128xf32>
    %162 = vector.extract_strided_slice %153 {offsets = [0, 384], sizes = [1, 128], strides = [1, 1]} : vector<1x512xf32> to vector<1x128xf32>
    %163 = arith.negf %162 : vector<1x128xf32>
    %164 = math.exp %163 : vector<1x128xf32>
    %cst_83 = arith.constant 1.000000e+00 : f32
    %165 = vector.broadcast %cst_83 : f32 to vector<1x128xf32>
    %166 = arith.addf %165, %164 : vector<1x128xf32>
    %167 = arith.divf %165, %166 : vector<1x128xf32>
    %168 = arith.mulf %159, %161 : vector<1x128xf32>
    %169 = math.tanh %168 : vector<1x128xf32>
    %170 = arith.mulf %167, %169 : vector<1x128xf32>
    %171 = arith.truncf %170 : vector<1x128xf32> to vector<1x128xbf16>
    %c0_84 = arith.constant 0 : index
    %c0_85 = arith.constant 0 : index
    %172 = vector.load %arg23[%c0_84, %c0_85] : memref<128x128xbf16, #tpu.memory_space<vmem>>, vector<128x128xbf16>
    %cst_86 = arith.constant dense<0.000000e+00> : vector<1x128xf32>
    %173 = tpu.matmul %171, %172, %cst_86 {dimension_numbers = #tpu.dot_dimension_numbers<[1], [0], [0], [1], [0, 0, 1, 1], [], []>} : vector<1x128xbf16>, vector<128x128xbf16>, vector<1x128xf32> -> vector<1x128xf32>
    %c0_87 = arith.constant 0 : index
    %c0_88 = arith.constant 0 : index
    %174 = vector.load %arg24[%c0_87, %c0_88] : memref<1x128xf32, #tpu.memory_space<vmem>>, vector<1x128xf32>
    %175 = arith.addf %173, %174 : vector<1x128xf32>
    %176 = math.tanh %175 : vector<1x128xf32>
    %177 = arith.truncf %176 : vector<1x128xf32> to vector<1x128xbf16>
    %c0_89 = arith.constant 0 : index
    %c0_90 = arith.constant 0 : index
    %178 = vector.load %arg25[%c0_89, %c0_90] : memref<128x128xbf16, #tpu.memory_space<vmem>>, vector<128x128xbf16>
    %cst_91 = arith.constant dense<0.000000e+00> : vector<1x128xf32>
    %179 = tpu.matmul %177, %178, %cst_91 {dimension_numbers = #tpu.dot_dimension_numbers<[1], [0], [0], [1], [0, 0, 1, 1], [], []>} : vector<1x128xbf16>, vector<128x128xbf16>, vector<1x128xf32> -> vector<1x128xf32>
    %c0_92 = arith.constant 0 : index
    %c0_93 = arith.constant 0 : index
    %180 = vector.load %arg26[%c0_92, %c0_93] : memref<1x128xf32, #tpu.memory_space<vmem>>, vector<1x128xf32>
    %181 = arith.addf %179, %180 : vector<1x128xf32>
    %182 = arith.truncf %181 : vector<1x128xf32> to vector<1x128xbf16>
    %c0_94 = arith.constant 0 : index
    %c0_95 = arith.constant 0 : index
    %183 = vector.load %arg27[%c0_94, %c0_95] : memref<128x128xbf16, #tpu.memory_space<vmem>>, vector<128x128xbf16>
    %cst_96 = arith.constant dense<0.000000e+00> : vector<1x128xf32>
    %184 = tpu.matmul %182, %183, %cst_96 {dimension_numbers = #tpu.dot_dimension_numbers<[1], [0], [0], [1], [0, 0, 1, 1], [], []>} : vector<1x128xbf16>, vector<128x128xbf16>, vector<1x128xf32> -> vector<1x128xf32>
    %c0_97 = arith.constant 0 : index
    %c0_98 = arith.constant 0 : index
    %185 = vector.load %arg28[%c0_97, %c0_98] : memref<1x128xf32, #tpu.memory_space<vmem>>, vector<1x128xf32>
    %186 = arith.addf %184, %185 : vector<1x128xf32>
    %187 = arith.truncf %186 : vector<1x128xf32> to vector<1x128xbf16>
    %c0_99 = arith.constant 0 : index
    %c0_100 = arith.constant 0 : index
    %188 = vector.load %arg29[%c0_99, %c0_100] : memref<128x128xbf16, #tpu.memory_space<vmem>>, vector<128x128xbf16>
    %cst_101 = arith.constant dense<0.000000e+00> : vector<1x128xf32>
    %189 = tpu.matmul %187, %188, %cst_101 {dimension_numbers = #tpu.dot_dimension_numbers<[1], [0], [0], [1], [0, 0, 1, 1], [], []>} : vector<1x128xbf16>, vector<128x128xbf16>, vector<1x128xf32> -> vector<1x128xf32>
    %c0_102 = arith.constant 0 : index
    %c0_103 = arith.constant 0 : index
    %190 = vector.load %arg30[%c0_102, %c0_103] : memref<1x128xf32, #tpu.memory_space<vmem>>, vector<1x128xf32>
    %191 = arith.addf %189, %190 : vector<1x128xf32>
    %192 = vector.shape_cast %191 : vector<1x128xf32> to vector<1x128xf32>
    %193 = vector.broadcast %192 : vector<1x128xf32> to vector<8x128xf32>
    %c0_104 = arith.constant 0 : index
    %c0_105 = arith.constant 0 : index
    %c0_106 = arith.constant 0 : index
    %194 = vector.load %arg31[%c0_104, %c0_105, %c0_106] : memref<1x8x128xf32, #tpu.memory_space<vmem>>, vector<1x8x128xf32>
    %195 = vector.shape_cast %194 : vector<1x8x128xf32> to vector<8x128xf32>
    %196 = vector.shape_cast %193 : vector<8x128xf32> to vector<1x8x128xf32>
    tpu.vector_store %arg31[%c0_104, %c0_105, %c0_106], %196 {strides = array<i32>} : memref<1x8x128xf32, #tpu.memory_space<vmem>>, vector<1x8x128xf32>,
    return
  }
  func.func @transform_0(%arg0: i32) -> (i32, i32, i32) {
    %c0_i32 = arith.constant 0 : i32
    %c0_i32_0 = arith.constant 0 : i32
    %c0_i32_1 = arith.constant 0 : i32
    return %arg0, %c0_i32, %c0_i32_0 : i32, i32, i32
  }
  func.func @transform_1(%arg0: i32) -> (i32, i32, i32) {
    %c0_i32 = arith.constant 0 : i32
    %c0_i32_0 = arith.constant 0 : i32
    %c0_i32_1 = arith.constant 0 : i32
    return %arg0, %c0_i32, %c0_i32_0 : i32, i32, i32
  }
  func.func @transform_2(%arg0: i32) -> (i32, i32) {
    %c0_i32 = arith.constant 0 : i32
    %c0_i32_0 = arith.constant 0 : i32
    %c0_i32_1 = arith.constant 0 : i32
    return %c0_i32, %c0_i32_0 : i32, i32
  }
  func.func @transform_3(%arg0: i32) -> (i32, i32) {
    %c0_i32 = arith.constant 0 : i32
    %c0_i32_0 = arith.constant 0 : i32
    %c0_i32_1 = arith.constant 0 : i32
    return %c0_i32, %c0_i32_0 : i32, i32
  }
  func.func @transform_4(%arg0: i32) -> (i32, i32, i32) {
    %c0_i32 = arith.constant 0 : i32
    %c0_i32_0 = arith.constant 0 : i32
    %c0_i32_1 = arith.constant 0 : i32
    %c0_i32_2 = arith.constant 0 : i32
    return %c0_i32, %c0_i32_0, %c0_i32_1 : i32, i32, i32
  }
  func.func @transform_5(%arg0: i32) -> (i32, i32, i32) {
    %c0_i32 = arith.constant 0 : i32
    %c0_i32_0 = arith.constant 0 : i32
    %c0_i32_1 = arith.constant 0 : i32
    %c0_i32_2 = arith.constant 0 : i32
    return %c0_i32, %c0_i32_0, %c0_i32_1 : i32, i32, i32
  }
  func.func @transform_6(%arg0: i32) -> (i32, i32, i32) {
    %c0_i32 = arith.constant 0 : i32
    %c0_i32_0 = arith.constant 0 : i32
    %c0_i32_1 = arith.constant 0 : i32
    %c0_i32_2 = arith.constant 0 : i32
    return %c0_i32, %c0_i32_0, %c0_i32_1 : i32, i32, i32
  }
  func.func @transform_7(%arg0: i32) -> (i32, i32, i32) {
    %c0_i32 = arith.constant 0 : i32
    %c0_i32_0 = arith.constant 0 : i32
    %c0_i32_1 = arith.constant 0 : i32
    %c0_i32_2 = arith.constant 0 : i32
    return %c0_i32, %c0_i32_0, %c0_i32_1 : i32, i32, i32
  }
  func.func @transform_8(%arg0: i32) -> (i32, i32, i32) {
    %c0_i32 = arith.constant 0 : i32
    %c0_i32_0 = arith.constant 0 : i32
    %c0_i32_1 = arith.constant 0 : i32
    %c0_i32_2 = arith.constant 0 : i32
    return %c0_i32, %c0_i32_0, %c0_i32_1 : i32, i32, i32
  }
  func.func @transform_9(%arg0: i32) -> (i32, i32, i32) {
    %c0_i32 = arith.constant 0 : i32
    %c0_i32_0 = arith.constant 0 : i32
    %c0_i32_1 = arith.constant 0 : i32
    %c0_i32_2 = arith.constant 0 : i32
    return %c0_i32, %c0_i32_0, %c0_i32_1 : i32, i32, i32
  }
  func.func @transform_10(%arg0: i32) -> (i32, i32, i32) {
    %c0_i32 = arith.constant 0 : i32
    %c0_i32_0 = arith.constant 0 : i32
    %c0_i32_1 = arith.constant 0 : i32
    %c0_i32_2 = arith.constant 0 : i32
    return %c0_i32, %c0_i32_0, %c0_i32_1 : i32, i32, i32
  }
  func.func @transform_11(%arg0: i32) -> (i32, i32) {
    %c0_i32 = arith.constant 0 : i32
    %c0_i32_0 = arith.constant 0 : i32
    %c0_i32_1 = arith.constant 0 : i32
    return %c0_i32, %c0_i32_0 : i32, i32
  }
  func.func @transform_12(%arg0: i32) -> (i32, i32) {
    %c0_i32 = arith.constant 0 : i32
    %c0_i32_0 = arith.constant 0 : i32
    %c0_i32_1 = arith.constant 0 : i32
    return %c0_i32, %c0_i32_0 : i32, i32
  }
  func.func @transform_13(%arg0: i32) -> (i32, i32) {
    %c0_i32 = arith.constant 0 : i32
    %c0_i32_0 = arith.constant 0 : i32
    %c0_i32_1 = arith.constant 0 : i32
    return %c0_i32, %c0_i32_0 : i32, i32
  }
  func.func @transform_14(%arg0: i32) -> (i32, i32) {
    %c0_i32 = arith.constant 0 : i32
    %c0_i32_0 = arith.constant 0 : i32
    %c0_i32_1 = arith.constant 0 : i32
    return %c0_i32, %c0_i32_0 : i32, i32
  }
  func.func @transform_15(%arg0: i32) -> (i32, i32) {
    %c0_i32 = arith.constant 0 : i32
    %c0_i32_0 = arith.constant 0 : i32
    %c0_i32_1 = arith.constant 0 : i32
    return %c0_i32, %c0_i32_0 : i32, i32
  }
  func.func @transform_16(%arg0: i32) -> (i32, i32) {
    %c0_i32 = arith.constant 0 : i32
    %c0_i32_0 = arith.constant 0 : i32
    %c0_i32_1 = arith.constant 0 : i32
    return %c0_i32, %c0_i32_0 : i32, i32
  }
  func.func @transform_17(%arg0: i32) -> (i32, i32) {
    %c0_i32 = arith.constant 0 : i32
    %c0_i32_0 = arith.constant 0 : i32
    %c0_i32_1 = arith.constant 0 : i32
    return %c0_i32, %c0_i32_0 : i32, i32
  }
  func.func @transform_18(%arg0: i32) -> (i32, i32) {
    %c0_i32 = arith.constant 0 : i32
    %c0_i32_0 = arith.constant 0 : i32
    %c0_i32_1 = arith.constant 0 : i32
    return %c0_i32, %c0_i32_0 : i32, i32
  }
  func.func @transform_19(%arg0: i32) -> (i32, i32) {
    %c0_i32 = arith.constant 0 : i32
    %c0_i32_0 = arith.constant 0 : i32
    %c0_i32_1 = arith.constant 0 : i32
    return %c0_i32, %c0_i32_0 : i32, i32
  }
  func.func @transform_20(%arg0: i32) -> (i32, i32) {
    %c0_i32 = arith.constant 0 : i32
    %c0_i32_0 = arith.constant 0 : i32
    %c0_i32_1 = arith.constant 0 : i32
    return %c0_i32, %c0_i32_0 : i32, i32
  }
  func.func @transform_21(%arg0: i32) -> (i32, i32) {
    %c0_i32 = arith.constant 0 : i32
    %c0_i32_0 = arith.constant 0 : i32
    %c0_i32_1 = arith.constant 0 : i32
    return %c0_i32, %c0_i32_0 : i32, i32
  }
  func.func @transform_22(%arg0: i32) -> (i32, i32) {
    %c0_i32 = arith.constant 0 : i32
    %c0_i32_0 = arith.constant 0 : i32
    %c0_i32_1 = arith.constant 0 : i32
    return %c0_i32, %c0_i32_0 : i32, i32
  }
  func.func @transform_23(%arg0: i32) -> (i32, i32) {
    %c0_i32 = arith.constant 0 : i32
    %c0_i32_0 = arith.constant 0 : i32
    %c0_i32_1 = arith.constant 0 : i32
    return %c0_i32, %c0_i32_0 : i32, i32
  }
  func.func @transform_24(%arg0: i32) -> (i32, i32) {
    %c0_i32 = arith.constant 0 : i32
    %c0_i32_0 = arith.constant 0 : i32
    %c0_i32_1 = arith.constant 0 : i32
    return %c0_i32, %c0_i32_0 : i32, i32
  }
  func.func @transform_25(%arg0: i32) -> (i32, i32) {
    %c0_i32 = arith.constant 0 : i32
    %c0_i32_0 = arith.constant 0 : i32
    %c0_i32_1 = arith.constant 0 : i32
    return %c0_i32, %c0_i32_0 : i32, i32
  }
  func.func @transform_26(%arg0: i32) -> (i32, i32) {
    %c0_i32 = arith.constant 0 : i32
    %c0_i32_0 = arith.constant 0 : i32
    %c0_i32_1 = arith.constant 0 : i32
    return %c0_i32, %c0_i32_0 : i32, i32
  }
  func.func @transform_27(%arg0: i32) -> (i32, i32) {
    %c0_i32 = arith.constant 0 : i32
    %c0_i32_0 = arith.constant 0 : i32
    %c0_i32_1 = arith.constant 0 : i32
    return %c0_i32, %c0_i32_0 : i32, i32
  }
  func.func @transform_28(%arg0: i32) -> (i32, i32) {
    %c0_i32 = arith.constant 0 : i32
    %c0_i32_0 = arith.constant 0 : i32
    %c0_i32_1 = arith.constant 0 : i32
    return %c0_i32, %c0_i32_0 : i32, i32
  }
  func.func @transform_29(%arg0: i32) -> (i32, i32) {
    %c0_i32 = arith.constant 0 : i32
    %c0_i32_0 = arith.constant 0 : i32
    %c0_i32_1 = arith.constant 0 : i32
    return %c0_i32, %c0_i32_0 : i32, i32
  }
  func.func @transform_30(%arg0: i32) -> (i32, i32, i32) {
    %c0_i32 = arith.constant 0 : i32
    %c0_i32_0 = arith.constant 0 : i32
    %c0_i32_1 = arith.constant 0 : i32
    return %arg0, %c0_i32, %c0_i32_0 : i32, i32, i32
  }
}

</mosaic_0001>

<bundles_post_ra>
// kernel: roberta_classifier_forward.1
= control target key start
LH: loop header
LB: loop body
LE: loop exit
PB: predicated region body
PF: predicated region fallthrough
CT: control target
= control target key end

     0   :  { %s4898_s6 = smov 1   ;;  %s4899_s10 = smov 2   ;;  %s5502_s0 = inlined_call_operand.smem [shape: u32[31], index: -1, kind: input, shape index: {}] }
   0x1   :  { %s4937_s5 = sld [smem:[%s5502_s0]]   ;;  %s4900_s14 = smov 3  }
   0x2   :  { %s4942_s9 = sld [smem:[%s5502_s0 + %s4898_s6]]   ;;  %s4901_s18 = smov 4  }
   0x3   :  { %s4947_s13 = sld [smem:[%s5502_s0 + %s4899_s10]]   ;;  %s4902_s22 = smov 5  }
   0x4   :  { %s4952_s17 = sld [smem:[%s5502_s0 + %s4900_s14]]   ;;  %s4903_s26 = smov 6  }
   0x5   :  { %s4957_s21 = sld [smem:[%s5502_s0 + %s4901_s18]]   ;;  %s4904_s30 = smov 7  }
   0x6   :  { %s4962_s25 = sld [smem:[%s5502_s0 + %s4902_s22]]   ;;  %s4905_s4 = smov 8  }
   0x7   :  { %s4967_s29 = sld [smem:[%s5502_s0 + %s4903_s26]]   ;;  %s4906_s10 = smov 9  }
   0x8   :  { %s4972_s3 = sld [smem:[%s5502_s0 + %s4904_s30]]   ;;  %s4907_s15 = smov 10  }
   0x9   :  { %s4977_s8 = sld [smem:[%s5502_s0 + %s4905_s4]]   ;;  %s4908_s20 = smov 11  }
   0xa   :  { %s4982_s14 = sld [smem:[%s5502_s0 + %s4906_s10]]   ;;  %s4909_s26 = smov 12  }
   0xb   :  { %s4987_s19 = sld [smem:[%s5502_s0 + %s4907_s15]]   ;;  %s4910_s1 = smov 13  }
   0xc   :  { %s4992_s24 = sld [smem:[%s5502_s0 + %s4908_s20]]   ;;  %s4911_s7 = smov 14  }
   0xd   :  { %s4997_s30 = sld [smem:[%s5502_s0 + %s4909_s26]]   ;;  %s4912_s15 = smov 15  }
   0xe   :  { %s5002_s6 = sld [smem:[%s5502_s0 + %s4910_s1]]   ;;  %s4913_s22 = smov 16  }
   0xf   :  { %s5007_s12 = sld [smem:[%s5502_s0 + %s4911_s7]]   ;;  %s4914_s28 = smov 17  }
  0x10   :  { %s5012_s20 = sld [smem:[%s5502_s0 + %s4912_s15]]   ;;  %s4915_s7 = smov 18  }
  0x11   :  { %s5017_s27 = sld [smem:[%s5502_s0 + %s4913_s22]]   ;;  %s4916_s15 = smov 19  }
  0x12   :  { %s5022_s4 = sld [smem:[%s5502_s0 + %s4914_s28]]   ;;  %s4917_s22 = smov 20  }
  0x13   :  { %5507 = sst [smem:[#allocation2_spill]] %s4997_s30  ;;  %s4918_s28 = smov 21  }
  0x14   :  { %5508 = sst [smem:[#allocation3_spill]] %s5002_s6 }
  0x15   :  { %s5027_s6 = sld [smem:[%s5502_s0 + %s4915_s7]]   ;;  %s4919_s7 = smov 22  }
  0x16   :  { %5509 = sst [smem:[#allocation4_spill]] %s5012_s20 }
  0x17   :  { %s5032_s20 = sld [smem:[%s5502_s0 + %s4916_s15]]   ;;  %s4920_s15 = smov 23  }
  0x18   :  { %5510 = sst [smem:[#allocation5_spill]] %s5022_s4 }
  0x19   :  { %s5037_s30 = sld [smem:[%s5502_s0 + %s4917_s22]]   ;;  %s4921_s22 = smov 24  }
  0x1a   :  { %s5042_s4 = sld [smem:[%s5502_s0 + %s4918_s28]]   ;;  %s4922_s28 = smov 25  }
  0x1b   :  { %5511 = sst [smem:[#allocation6_spill]] %s5027_s6 }
  0x1c   :  { %s5047_s6 = sld [smem:[%s5502_s0 + %s4919_s7]]   ;;  %s4923_s7 = smov 26  }
  0x1d   :  { %5512 = sst [smem:[#allocation7_spill]] %s5032_s20 }
  0x1e   :  { %s5052_s20 = sld [smem:[%s5502_s0 + %s4920_s15]]   ;;  %s4924_s15 = smov 27  }
  0x1f   :  { %5513 = sst [smem:[#allocation8_spill]] %s5037_s30 }
  0x20   :  { %5514 = sst [smem:[#allocation9_spill]] %s5042_s4 }
  0x21   :  { %s5057_s30 = sld [smem:[%s5502_s0 + %s4921_s22]]   ;;  %s4925_s22 = smov 28  }
  0x22   :  { %5515 = sst [smem:[#allocation10_spill]] %s5047_s6 }
  0x23   :  { %s5062_s4 = sld [smem:[%s5502_s0 + %s4922_s28]]   ;;  %s4926_s28 = smov 29  }
  0x24   :  { %5516 = sst [smem:[#allocation11_spill]] %s5052_s20 }
  0x25   :  { %s5067_s6 = sld [smem:[%s5502_s0 + %s4923_s7]]   ;;  %s4927_s7 = smov 30  }
  0x26   :  { %s5072_s20 = sld [smem:[%s5502_s0 + %s4924_s15]]   ;;  %s5089_s15 = smov 0  }
  0x27   :  { %5517 = sst [smem:[#allocation12_spill]] %s5057_s30 }
  0x28   :  { %s5077_s30 = sld [smem:[%s5502_s0 + %s4925_s22]]  }
  0x29   :  { %5518 = sst [smem:[#allocation13_spill]] %s5062_s4 }
  0x2a   :  { %s5082_s4 = sld [smem:[%s5502_s0 + %s4926_s28]]  }
  0x2b   :  { %5519 = sst [smem:[#allocation14_spill]] %s5067_s6 }
  0x2c   :  { %s5087_s6 = sld [smem:[%s5502_s0 + %s4927_s7]]  }
  0x2d LB: > { %s3641_s16 = sadd.s32 4294967295, %s4896_s15   ;;  %p3645_p0 = scmp.ge.s32.totalorder %s4896_s15, 1  ;;  %s4896_s15 = sphi %s5089_s15, %s71_s15  }
  0x2e   : > { %p850_p1 = scmp.lt.s32.totalorder %s4896_s15, 3 }
  0x30   : > { %p851_p2 = pnand %p3645_p0, %p850_p1 }
  0x31   : > { %p929_p3 = scmp.lt.s32.totalorder (!%p851_p2), %s3641_s16, 1  ;;  %s5520_s23 = sld [smem:[#allocation2_spill]] (!%p851_p2) }
  0x32   : > { %854 = sbr.rel (%p851_p2) target bundleno = 2705 (0xa91), region = 140  ;;  %s5521_s26 = sld [smem:[#allocation3_spill]] (!%p851_p2) }
  0x33   : > { %s5522_s28 = sld [smem:[#allocation4_spill]] (!%p851_p2) }
  0x34   : > { %s5523_s1 = sld [smem:[#allocation5_spill]] (!%p851_p2) }
  0x35   : > { %s5524_s2 = sld [smem:[#allocation8_spill]] (!%p851_p2) }
  0x36   : > { %s5525_s7 = sld [smem:[#allocation6_spill]] (!%p851_p2) }
  0x37   : > { %s5534_s16 = smov (!%p929_p3, %s3641_s16), 1  ;;  %v4928_v1 = vmov 128.0   ;;  %v4567_v2 = vld [vmem:[%s4957_s21 + $0x38] sm:$0xff]  ;;  %v4566_v6 = vld [vmem:[%s4957_s21 + $0x30] sm:$0xff]  ;;  %v4565_v11 = vld [vmem:[%s4957_s21 + $0x28] sm:$0xff]  ;;  %vm1964_vm4 = vcmask 261120  }
  0x38   : > { %s3646_s0 = sshll.u32 %s5534_s16, 3  ;;  %s935_s18 = scalar_lea.vmem %s4942_s9, %s5534_s16  ;;  %4844 = vrcp.f32 %v4928_v1  ;;  %v4575_v3 = vld [vmem:[%s4957_s21 + $0x78] sm:$0xff]  ;;  %1108 = vmatpush.bf16.msra.mxu0 %v4567_v2  ;;  %v4574_v7 = vld [vmem:[%s4957_s21 + $0x70] sm:$0xff]  ;;  %v4573_v12 = vld [vmem:[%s4957_s21 + $0x68] sm:$0xff]  ;;  %vm2097_vm5 = vcmask 1043456   ;;  %vm2041_vm6 = vcmask 64512  }
  0x39   : > { %s932_s22 = scalar_lea.vmem %s4937_s5, %s3646_s0  ;;  %v4583_v4 = vld [vmem:[%s4957_s21 + $0xb8] sm:$0xff]  ;;  %1169 = vmatpush.bf16.msra.mxu1 %v4575_v3  ;;  %v4582_v8 = vld [vmem:[%s4957_s21 + $0xb0] sm:$0xff]  ;;  %v4581_v14 = vld [vmem:[%s4957_s21 + $0xa8] sm:$0xff]  ;;  %s5526_s10 = sld [smem:[#allocation7_spill]] }
  0x3a   : > { %v5105_v0 = vld [vmem:[%s932_s22] sm:$0xff]  ;;  %v4591_v5 = vld [vmem:[%s4957_s21 + $0xf8] sm:$0xff]  ;;  %1230 = vmatpush.bf16.msra.mxu2 %v4583_v4  ;;  %v4590_v9 = vld [vmem:[%s4957_s21 + $0xf0] sm:$0xff]  ;;  %s5527_s11 = sld [smem:[#allocation10_spill]] }
  0x3b   : > { %944 = vadd.xlane.f32.xlu0 %v5105_v0  ;;  %1291 = vmatpush.bf16.msra.mxu3 %v4591_v5  ;;  %v4589_v15 = vld [vmem:[%s4957_s21 + $0xe8] sm:$0xff]  ;;  %v4564_v16 = vld [vmem:[%s4957_s21 + $0x20] sm:$0xff]  ;;  %v4563_v21 = vld [vmem:[%s4957_s21 + $0x18] sm:$0xff]  ;;  %s5529_s22 = sld [smem:[#allocation12_spill]] }
  0x3c   : > { %1109 = vmatpush.bf16.msra.mxu0 %v4566_v6  ;;  %v4572_v17 = vld [vmem:[%s4957_s21 + $0x60] sm:$0xff]  ;;  %v4571_v22 = vld [vmem:[%s4957_s21 + $0x58] sm:$0xff]  ;;  %v4562_v26 = vld [vmem:[%s4957_s21 + $0x10] sm:$0xff] }
  0x3d   : > { %1170 = vmatpush.bf16.msra.mxu1 %v4574_v7  ;;  %v4580_v19 = vld [vmem:[%s4957_s21 + $0xa0] sm:$0xff]  ;;  %v4579_v24 = vld [vmem:[%s4957_s21 + $0x98] sm:$0xff]  ;;  %v4570_v27 = vld [vmem:[%s4957_s21 + $0x50] sm:$0xff] }
  0x3e   : > { %v4845_v10 = vpop.eup %4844  ;;  %1231 = vmatpush.bf16.msra.mxu2 %v4582_v8  ;;  %v4588_v20 = vld [vmem:[%s4957_s21 + $0xe0] sm:$0xff]  ;;  %v4587_v25 = vld [vmem:[%s4957_s21 + $0xd8] sm:$0xff]  ;;  %v4578_v29 = vld [vmem:[%s4957_s21 + $0x90] sm:$0xff] }
  0x3f   : > { %v947_v13 = vmul.f32 128.0, %v4845_v10  ;;  %1292 = vmatpush.bf16.msra.mxu3 %v4590_v9  ;;  %v4586_v30 = vld [vmem:[%s4957_s21 + $0xd0] sm:$0xff]  ;;  %vm951_vm0 = vweird.f32 %v4845_v10  ;;  %v4561_v31 = vld [vmem:[%s4957_s21 + $0x8] sm:$0xff]  ;;  %v4560_v40 = vld [vmem:[%s4957_s21] sm:$0xff] }
  0x40   : > { %1110 = vmatpush.bf16.msra.mxu0 %v4565_v11  ;;  %v4569_v32 = vld [vmem:[%s4957_s21 + $0x48] sm:$0xff]  ;;  %v4568_v41 = vld [vmem:[%s4957_s21 + $0x40] sm:$0xff]  ;;  %v4599_v44 = vld [vmem:[%s4962_s25 + $0x38] sm:$0xff] }
  0x41   : > { %1171 = vmatpush.bf16.msra.mxu1 %v4573_v12  ;;  %v948_v18 = vsub.f32 1.0, %v947_v13  ;;  %v4577_v34 = vld [vmem:[%s4957_s21 + $0x88] sm:$0xff]  ;;  %v4576_v42 = vld [vmem:[%s4957_s21 + $0x80] sm:$0xff]  ;;  %v4607_v45 = vld [vmem:[%s4962_s25 + $0x78] sm:$0xff] }
  0x42   : > { %1232 = vmatpush.bf16.msra.mxu2 %v4581_v14  ;;  %v4585_v35 = vld [vmem:[%s4957_s21 + $0xc8] sm:$0xff]  ;;  %v4584_v43 = vld [vmem:[%s4957_s21 + $0xc0] sm:$0xff]  ;;  %v4615_v46 = vld [vmem:[%s4962_s25 + $0xb8] sm:$0xff] }
  0x43   : > { %1293 = vmatpush.bf16.msra.mxu3 %v4589_v15  ;;  %v949_v23 = vmul.f32 %v4845_v10, %v948_v18  ;;  %v4623_v47 = vld [vmem:[%s4962_s25 + $0xf8] sm:$0xff]  ;;  %v4598_v48 = vld [vmem:[%s4962_s25 + $0x30] sm:$0xff]  ;;  %v4597_v52 = vld [vmem:[%s4962_s25 + $0x28] sm:$0xff] }
  0x44   : > { %1111 = vmatpush.bf16.msra.mxu0 %v4564_v16  ;;  %v4606_v49 = vld [vmem:[%s4962_s25 + $0x70] sm:$0xff]  ;;  %v4605_v53 = vld [vmem:[%s4962_s25 + $0x68] sm:$0xff]  ;;  %v4596_v56 = vld [vmem:[%s4962_s25 + $0x20] sm:$0xff] }
  0x45   : > { %1172 = vmatpush.bf16.msra.mxu1 %v4572_v17  ;;  %v950_v28 = vadd.f32 %v4845_v10, %v949_v23  ;;  %v4614_v50 = vld [vmem:[%s4962_s25 + $0xb0] sm:$0xff]  ;;  %v4613_v54 = vld [vmem:[%s4962_s25 + $0xa8] sm:$0xff]  ;;  %v4604_v57 = vld [vmem:[%s4962_s25 + $0x60] sm:$0xff] }
  0x46   : > { %1233 = vmatpush.bf16.msra.mxu2 %v4580_v19  ;;  %v4622_v51 = vld [vmem:[%s4962_s25 + $0xf0] sm:$0xff]  ;;  %v4621_v55 = vld [vmem:[%s4962_s25 + $0xe8] sm:$0xff]  ;;  %v4612_v58 = vld [vmem:[%s4962_s25 + $0xa0] sm:$0xff] }
  0x47   : > { %1294 = vmatpush.bf16.msra.mxu3 %v4588_v20  ;;  %v5134_v33 = vsel %vm951_vm0, %v4845_v10, %v950_v28  ;;  %v4620_v59 = vld [vmem:[%s4962_s25 + $0xe0] sm:$0xff]  ;;  %v4595_v60 = vld [vmem:[%s4962_s25 + $0x18] sm:$0xff]  ;;  %v4602_v1 = vld [vmem:[%s4962_s25 + $0x50] sm:$0xff] }
  0x48   : > { %1112 = vmatpush.bf16.msra.mxu0 %v4563_v21  ;;  %v4603_v61 = vld [vmem:[%s4962_s25 + $0x58] sm:$0xff]  ;;  %v4610_v2 = vld [vmem:[%s4962_s25 + $0x90] sm:$0xff]  ;;  %v4593_v4 = vld [vmem:[%s4962_s25 + $0x8] sm:$0xff] }
  0x49   : > { %1173 = vmatpush.bf16.msra.mxu1 %v4571_v22  ;;  %v4611_v62 = vld [vmem:[%s4962_s25 + $0x98] sm:$0xff]  ;;  %v4618_v3 = vld [vmem:[%s4962_s25 + $0xd0] sm:$0xff]  ;;  %v4601_v5 = vld [vmem:[%s4962_s25 + $0x48] sm:$0xff] }
  0x4a   : > { %1234 = vmatpush.bf16.msra.mxu2 %v4579_v24  ;;  %v4619_v63 = vld [vmem:[%s4962_s25 + $0xd8] sm:$0xff]  ;;  %v4609_v6 = vld [vmem:[%s4962_s25 + $0x88] sm:$0xff]  ;;  %v4592_v8 = vld [vmem:[%s4962_s25] sm:$0xff] }
  0x4b   : > { %1295 = vmatpush.bf16.msra.mxu3 %v4587_v25  ;;  %v4617_v7 = vld [vmem:[%s4962_s25 + $0xc8] sm:$0xff]  ;;  %v4600_v9 = vld [vmem:[%s4962_s25 + $0x40] sm:$0xff]  ;;  %v4631_v28 = vld [vmem:[%s4967_s29 + $0x38] sm:$0xff] }
  0x4c   : > { %1113 = vmatpush.bf16.msra.mxu0 %v4562_v26  ;;  %v4608_v10 = vld [vmem:[%s4962_s25 + $0x80] sm:$0xff] }
  0x4d   : > { %1174 = vmatpush.bf16.msra.mxu1 %v4570_v27  ;;  %v4616_v11 = vld [vmem:[%s4962_s25 + $0xc0] sm:$0xff] }
  0x4e   : > { %1235 = vmatpush.bf16.msra.mxu2 %v4578_v29  ;;  %v4824_v21 = vld [vmem:[%s4947_s13] ss:$0 sm:$0xff]  ;;  %v4639_v29 = vld [vmem:[%s4967_s29 + $0x78] sm:$0xff] }
  0x4f   : > { %1296 = vmatpush.bf16.msra.mxu3 %v4586_v30  ;;  %v4825_v23 = vld [vmem:[%s4952_s17] ss:$0 sm:$0xff]  ;;  %v4647_v30 = vld [vmem:[%s4967_s29 + $0xb8] sm:$0xff] }
  0x50   : > { %1114 = vmatpush.bf16.msra.mxu0 %v4561_v31  ;;  %v4655_v31 = vld [vmem:[%s4967_s29 + $0xf8] sm:$0xff] }
  0x51   : > { %1175 = vmatpush.bf16.msra.mxu1 %v4569_v32  ;;  %v4630_v32 = vld [vmem:[%s4967_s29 + $0x30] sm:$0xff] }
  0x52   : > { %1236 = vmatpush.bf16.msra.mxu2 %v4577_v34  ;;  %v4638_v34 = vld [vmem:[%s4967_s29 + $0x70] sm:$0xff] }
  0x53   : > { %1297 = vmatpush.bf16.msra.mxu3 %v4585_v35  ;;  %v4646_v35 = vld [vmem:[%s4967_s29 + $0xb0] sm:$0xff] }
  0x54   : > { %1115 = vmatpush.bf16.msra.mxu0 %v4560_v40  ;;  %v4653_v40 = vld [vmem:[%s4967_s29 + $0xe8] sm:$0xff] }
  0x55   : > { %1176 = vmatpush.bf16.msra.mxu1 %v4568_v41  ;;  %v4628_v41 = vld [vmem:[%s4967_s29 + $0x20] sm:$0xff] }
  0x56   : > { %1237 = vmatpush.bf16.msra.mxu2 %v4576_v42  ;;  %v4636_v42 = vld [vmem:[%s4967_s29 + $0x60] sm:$0xff] }
  0x57   : > { %1298 = vmatpush.bf16.msra.mxu3 %v4584_v43  ;;  %v4644_v43 = vld [vmem:[%s4967_s29 + $0xa0] sm:$0xff] }
  0x58   : > { %1432 = vmatpush.bf16.msrb.mxu0 %v4599_v44  ;;  %v4652_v44 = vld [vmem:[%s4967_s29 + $0xe0] sm:$0xff] }
  0x59   : > { %1493 = vmatpush.bf16.msrb.mxu1 %v4607_v45  ;;  %v4627_v45 = vld [vmem:[%s4967_s29 + $0x18] sm:$0xff] }
  0x5a   : > { %1554 = vmatpush.bf16.msrb.mxu2 %v4615_v46  ;;  %v4635_v46 = vld [vmem:[%s4967_s29 + $0x58] sm:$0xff] }
  0x5b   : > { %1615 = vmatpush.bf16.msrb.mxu3 %v4623_v47  ;;  %v4643_v47 = vld [vmem:[%s4967_s29 + $0x98] sm:$0xff] }
  0x5c   : > { %1433 = vmatpush.bf16.msrb.mxu0 %v4598_v48  ;;  %v4651_v48 = vld [vmem:[%s4967_s29 + $0xd8] sm:$0xff] }
  0x5d   : > { %1494 = vmatpush.bf16.msrb.mxu1 %v4606_v49  ;;  %v4626_v49 = vld [vmem:[%s4967_s29 + $0x10] sm:$0xff] }
  0x5e   : > { %1555 = vmatpush.bf16.msrb.mxu2 %v4614_v50  ;;  %v4634_v50 = vld [vmem:[%s4967_s29 + $0x50] sm:$0xff] }
  0x5f   : > { %1616 = vmatpush.bf16.msrb.mxu3 %v4622_v51  ;;  %v4642_v51 = vld [vmem:[%s4967_s29 + $0x90] sm:$0xff] }
  0x60   : > { %1434 = vmatpush.bf16.msrb.mxu0 %v4597_v52  ;;  %v4650_v52 = vld [vmem:[%s4967_s29 + $0xd0] sm:$0xff] }
  0x61   : > { %1495 = vmatpush.bf16.msrb.mxu1 %v4605_v53  ;;  %v4625_v53 = vld [vmem:[%s4967_s29 + $0x8] sm:$0xff] }
  0x62   : > { %1556 = vmatpush.bf16.msrb.mxu2 %v4613_v54  ;;  %v4633_v54 = vld [vmem:[%s4967_s29 + $0x48] sm:$0xff] }
  0x63   : > { %1617 = vmatpush.bf16.msrb.mxu3 %v4621_v55  ;;  %v4641_v55 = vld [vmem:[%s4967_s29 + $0x88] sm:$0xff] }
  0x64   : > { %1435 = vmatpush.bf16.msrb.mxu0 %v4596_v56  ;;  %v4649_v56 = vld [vmem:[%s4967_s29 + $0xc8] sm:$0xff] }
  0x65   : > { %1496 = vmatpush.bf16.msrb.mxu1 %v4604_v57  ;;  %v4624_v57 = vld [vmem:[%s4967_s29] sm:$0xff] }
  0x66   : > { %1557 = vmatpush.bf16.msrb.mxu2 %v4612_v58  ;;  %v4632_v58 = vld [vmem:[%s4967_s29 + $0x40] sm:$0xff] }
  0x67   : > { %1618 = vmatpush.bf16.msrb.mxu3 %v4620_v59  ;;  %v4640_v59 = vld [vmem:[%s4967_s29 + $0x80] sm:$0xff] }
  0x68   : > { %1436 = vmatpush.bf16.msrb.mxu0 %v4595_v60  ;;  %v4648_v60 = vld [vmem:[%s4967_s29 + $0xc0] sm:$0xff] }
  0x69   : > { %1497 = vmatpush.bf16.msrb.mxu1 %v4603_v61 }
  0x6a   : > { %1558 = vmatpush.bf16.msrb.mxu2 %v4611_v62 }
  0x6b   : > { %1619 = vmatpush.bf16.msrb.mxu3 %v4619_v63 }
  0x6d   : > { %1498 = vmatpush.bf16.msrb.mxu1 %v4602_v1 }
  0x6e   : > { %1559 = vmatpush.bf16.msrb.mxu2 %v4610_v2 }
  0x6f   : > { %1620 = vmatpush.bf16.msrb.mxu3 %v4618_v3  ;;  %v4830_v3 = vld [vmem:[%s4977_s8] ss:$0 sm:$0xff] }
  0x71   : > { %1499 = vmatpush.bf16.msrb.mxu1 %v4601_v5 }
  0x72   : > { %1560 = vmatpush.bf16.msrb.mxu2 %v4609_v6 }
  0x73   : > { %1621 = vmatpush.bf16.msrb.mxu3 %v4617_v7 }
  0x75   : > { %1500 = vmatpush.bf16.msrb.mxu1 %v4600_v9 }
  0x76   : > { %1561 = vmatpush.bf16.msrb.mxu2 %v4608_v10 }
  0x77   : > { %1622 = vmatpush.bf16.msrb.mxu3 %v4616_v11  ;;  %v4826_v11 = vld [vmem:[%s4972_s3] ss:$0 sm:$0xff] }
  0xae   : > { %v945_v36 = vpop.xlane.xlu0 %944 }
  0xaf   : > { %v953_v37 = vmul.f32 %v5134_v33, %v945_v36  ;;  %v4654_v36 = vld [vmem:[%s4967_s29 + $0xf0] sm:$0xff] }
  0xb1   : > { %v5140_v38 = vsub.f32 %v5105_v0, %v953_v37  ;;  %v4594_v0 = vld [vmem:[%s4962_s25 + $0x10] sm:$0xff]  ;;  %v4629_v37 = vld [vmem:[%s4967_s29 + $0x28] sm:$0xff] }
  0xb2   : > { %1437 = vmatpush.bf16.msrb.mxu0 %v4594_v0 }
  0xb3   : > { %v955_v39 = vmul.f32 %v5140_v38, %v5140_v38 }
  0xb5   : > { %956 = vadd.xlane.f32.xlu0 %v955_v39  ;;  %v4645_v39 = vld [vmem:[%s4967_s29 + $0xa8] sm:$0xff] }
  0xb6   : > { %1438 = vmatpush.bf16.msrb.mxu0 %v4593_v4  ;;  %v4831_v4 = vld [vmem:[%s4977_s8 + $0x1] ss:$0 sm:$0xff] }
  0xba   : > { %1439 = vmatpush.bf16.msrb.mxu0 %v4592_v8 }
 0x128   : > { %v957_v12 = vpop.xlane.xlu0 %956 }
 0x129   : > { %v958_v13 = vmul.f32 %v957_v12, %v5134_v33 }
 0x12b   : > { %v959_v14 = vadd.f32 1e-05, %v958_v13 }
 0x12d   : > { %4846 = vrsqrt.f32 %v959_v14  ;;  %vm966_vm2 = vweird.f32 %v959_v14 }
 0x133   : > { %v4847_v15 = vpop.eup %4846 }
 0x134   : > { %v961_v16 = vmul.f32 %v4847_v15, %v959_v14  ;;  %vm967_vm1 = vweird.f32 %v4847_v15  ;;  %v4827_v14 = vld [vmem:[%s4972_s3 + $0x1] ss:$0 sm:$0xff] }
 0x135   : > { %vm968_vm3 = vmor %vm966_vm2, %vm967_vm1 }
 0x136   : > { %v962_v17 = vmul.f32 %v4847_v15, %v961_v16  ;;  %v4833_v16 = vld [vmem:[%s4977_s8 + $0x3] ss:$0 sm:$0xff] }
 0x138   : > { %v963_v18 = vmul.f32 0.5, %v962_v17 }
 0x13a   : > { %v964_v19 = vsub.f32 1.5, %v963_v18 }
 0x13c   : > { %v965_v20 = vmul.f32 %v4847_v15, %v964_v19 }
 0x13e   : > { %v969_v22 = vsel %vm968_vm3, %v4847_v15, %v965_v20  ;;  %v4832_v15 = vld [vmem:[%s4977_s8 + $0x2] ss:$0 sm:$0xff] }
 0x13f   : > { %v970_v24 = vmul.f32 %v969_v22, %v5140_v38  ;;  %v4637_v38 = vld [vmem:[%s4967_s29 + $0x68] sm:$0xff] }
 0x141   : > { %v974_v25 = vmul.f32 %v4824_v21, %v970_v24 }
 0x143   : > { %v5184_v26 = vadd.f32 %v4825_v23, %v974_v25 }
 0x145   : > { %v5188_v27 = vpack.c.bf16 %v5184_v26, %v5184_v26 }
 0x147   : > { %1116 = vmatmul.bf16.vlgmr.msra.gmra.mxu0 %v5188_v27  ;;  %1177 = vmatmul.bf16.vlgmr.msra.gmra.mxu1 %v5188_v27 }
 0x148   : > { %1238 = vmatmul.bf16.vlgmr.msra.gmra.mxu2 %v5188_v27  ;;  %1299 = vmatmul.bf16.vlgmr.msra.gmra.mxu3 %v5188_v27 }
 0x149   : > { %1756 = vmatpush.bf16.msra.mxu0 %v4631_v28  ;;  %1817 = vmatpush.bf16.msra.mxu1 %v4639_v29  ;;  %v4828_v28 = vld [vmem:[%s4972_s3 + $0x2] ss:$0 sm:$0xff] }
 0x14a   : > { %1878 = vmatpush.bf16.msra.mxu2 %v4647_v30  ;;  %1939 = vmatpush.bf16.msra.mxu3 %v4655_v31 }
 0x14d   : > { %1757 = vmatpush.bf16.msra.mxu0 %v4630_v32  ;;  %1818 = vmatpush.bf16.msra.mxu1 %v4638_v34 }
 0x14e   : > { %1879 = vmatpush.bf16.msra.mxu2 %v4646_v35  ;;  %1940 = vmatpush.bf16.msra.mxu3 %v4654_v36 }
 0x151   : > { %1758 = vmatpush.bf16.msra.mxu0 %v4629_v37  ;;  %1819 = vmatpush.bf16.msra.mxu1 %v4637_v38  ;;  %v4834_v37 = vld [vmem:[%s4982_s14] ss:$0 sm:$0xff]  ;;  %v4835_v38 = vld [vmem:[%s4982_s14 + $0x1] ss:$0 sm:$0xff] }
 0x152   : > { %1880 = vmatpush.bf16.msra.mxu2 %v4645_v39  ;;  %1941 = vmatpush.bf16.msra.mxu3 %v4653_v40 }
 0x155   : > { %1759 = vmatpush.bf16.msra.mxu0 %v4628_v41  ;;  %1820 = vmatpush.bf16.msra.mxu1 %v4636_v42 }
 0x156   : > { %1881 = vmatpush.bf16.msra.mxu2 %v4644_v43  ;;  %1942 = vmatpush.bf16.msra.mxu3 %v4652_v44 }
 0x157   : > { %1440 = vmatmul.bf16.vlgmr.msrb.gmra.mxu0 %v5188_v27  ;;  %1501 = vmatmul.bf16.vlgmr.msrb.gmra.mxu1 %v5188_v27 }
 0x158   : > { %1562 = vmatmul.bf16.vlgmr.msrb.gmra.mxu2 %v5188_v27  ;;  %1623 = vmatmul.bf16.vlgmr.msrb.gmra.mxu3 %v5188_v27 }
 0x159   : > { %1760 = vmatpush.bf16.msra.mxu0 %v4627_v45  ;;  %1821 = vmatpush.bf16.msra.mxu1 %v4635_v46 }
 0x15a   : > { %1882 = vmatpush.bf16.msra.mxu2 %v4643_v47  ;;  %1943 = vmatpush.bf16.msra.mxu3 %v4651_v48  ;;  %v4829_v48 = vld [vmem:[%s4972_s3 + $0x3] ss:$0 sm:$0xff] }
 0x15d   : > { %1761 = vmatpush.bf16.msra.mxu0 %v4626_v49  ;;  %1822 = vmatpush.bf16.msra.mxu1 %v4634_v50  ;;  %v4836_v49 = vld [vmem:[%s4982_s14 + $0x2] ss:$0 sm:$0xff]  ;;  %v4837_v50 = vld [vmem:[%s4982_s14 + $0x3] ss:$0 sm:$0xff] }
 0x15e   : > { %1883 = vmatpush.bf16.msra.mxu2 %v4642_v51  ;;  %1944 = vmatpush.bf16.msra.mxu3 %v4650_v52 }
 0x161   : > { %1762 = vmatpush.bf16.msra.mxu0 %v4625_v53  ;;  %1823 = vmatpush.bf16.msra.mxu1 %v4633_v54 }
 0x162   : > { %1884 = vmatpush.bf16.msra.mxu2 %v4641_v55  ;;  %1945 = vmatpush.bf16.msra.mxu3 %v4649_v56 }
 0x165   : > { %1763 = vmatpush.bf16.msra.mxu0 %v4624_v57  ;;  %1824 = vmatpush.bf16.msra.mxu1 %v4632_v58 }
 0x166   : > { %1885 = vmatpush.bf16.msra.mxu2 %v4640_v59  ;;  %1946 = vmatpush.bf16.msra.mxu3 %v4648_v60 }
 0x168   : > { %1764 = vmatmul.bf16.vlgmr.msra.gmra.mxu0 %v5188_v27  ;;  %1825 = vmatmul.bf16.vlgmr.msra.gmra.mxu1 %v5188_v27 }
 0x169   : > { %1886 = vmatmul.bf16.vlgmr.msra.gmra.mxu2 %v5188_v27  ;;  %1947 = vmatmul.bf16.vlgmr.msra.gmra.mxu3 %v5188_v27 }
 0x1c4   : > { %v1117_v61 = vpop.f32.mrf.mxu0  ;;  %v1178_v62 = vpop.f32.mrf.mxu1 }
 0x1c5   : > { %v1118_v21 = vadd.f32 %v4826_v11, %v1117_v61  ;;  %v1179_v22 = vadd.f32 %v4827_v14, %v1178_v62 }
 0x1c7   : > { %v1952_v31 = vpack.c.bf16 %v1118_v21, %v1118_v21  ;;  %v1953_v32 = vpack.c.bf16 %v1179_v22, %v1179_v22 }
 0x1cb   : > { %v1239_v63 = vpop.f32.mrf.mxu2  ;;  %v5234_v0 = vpop.f32.mrf.mxu3 }
 0x1cc   : > { %v1119_v1 = vpop.f32.mrf.mxu0  ;;  %v1180_v2 = vpop.f32.mrf.mxu1  ;;  %v1240_v36 = vadd.f32 %v4828_v28, %v1239_v63  ;;  %v1301_v55 = vadd.f32 %v4829_v48, %v5234_v0 }
 0x1ce   : > { %v1954_v43 = vpack.c.bf16 %v1240_v36, %v1240_v36  ;;  %v1955_v62 = vpack.c.bf16 %v1301_v55, %v1301_v55 }
 0x1d3   : > { %v1241_v5 = vpop.f32.mrf.mxu2  ;;  %v1302_v6 = vpop.f32.mrf.mxu3 }
 0x1d4   : > { %v1441_v7 = vpop.f32.mrf.mxu0  ;;  %v1502_v8 = vpop.f32.mrf.mxu1 }
 0x1d5   : > { %v1442_v9 = vadd.f32 %v4830_v3, %v1441_v7  ;;  %v1503_v10 = vadd.f32 %v4831_v4, %v1502_v8  ;;  %v4823_v4 = vld [vmem:[%s935_s18] ss:$0 sm:$0xff]  ;;  %s5528_s18 = sld [smem:[#allocation9_spill]] }
 0x1d7   : > { %v1956_v12 = vpack.c.bf16 %v1442_v9, %v1442_v9  ;;  %v1957_v13 = vpack.c.bf16 %v1503_v10, %v1503_v10 }
 0x1d9   : > { %v1969_v17 = vsel %vm1964_vm4, %v1956_v12, 0  ;;  %v1988_v18 = vsel %vm1964_vm4, %v1957_v13, 0 }
 0x1da   : > { %1978 = vmatpush.bf16.xpose.msrb.mxu3 %v1969_v17  ;;  %1997 = vmatpush.bf16.xpose.msrb.mxu1 %v1988_v18 }
 0x1db   : > { %v1563_v19 = vpop.f32.mrf.mxu2  ;;  %v1624_v20 = vpop.f32.mrf.mxu3 }
 0x1dc   : > { %v1564_v23 = vadd.f32 %v4832_v15, %v1563_v19  ;;  %v1625_v24 = vadd.f32 %v4833_v16, %v1624_v20  ;;  %v1443_v25 = vpop.f32.mrf.mxu0  ;;  %v1504_v27 = vpop.f32.mrf.mxu1 }
 0x1de   : > { %v1958_v29 = vpack.c.bf16 %v1564_v23, %v1564_v23  ;;  %v1959_v30 = vpack.c.bf16 %v1625_v24, %v1625_v24 }
 0x1e0   : > { %v2007_v34 = vsel %vm1964_vm4, %v1958_v29, 0  ;;  %v2026_v35 = vsel %vm1964_vm4, %v1959_v30, 0 }
 0x1e1   : > { %2016 = vmatpush.bf16.xpose.msrb.mxu2 %v2007_v34  ;;  %4032 = vmatmul.msk.bf16.vlgmr.msrb.gmra.mxu3 %vm1964_vm4, %v1952_v31 }
 0x1e2   : > { %2035 = vmatpush.bf16.xpose.msra.mxu3 %v2026_v35  ;;  %4033 = vmatmul.msk.bf16.vlgmr.msrb.gmra.mxu1 %vm1964_vm4, %v1953_v32 }
 0x1e3   : > { %v1565_v39 = vpop.f32.mrf.mxu2  ;;  %v1626_v40 = vpop.f32.mrf.mxu3 }
 0x1e5   : > { %v1765_v41 = vpop.f32.mrf.mxu0  ;;  %v1826_v42 = vpop.f32.mrf.mxu1 }
 0x1e6   : > { %v1766_v44 = vadd.f32 %v4834_v37, %v1765_v41  ;;  %v1827_v45 = vadd.f32 %v4835_v38, %v1826_v42  ;;  %v4657_v42 = vld [vmem:[%s4987_s19 + $0x8] sm:$0xff] }
 0x1e8   : > { %v2090_v46 = vpack.c.bf16 %v1766_v44, %v1766_v44  ;;  %v2091_v47 = vpack.c.bf16 %v1827_v45, %v1827_v45  ;;  %4034 = vmatmul.msk.bf16.vlgmr.msrb.gmra.mxu2 %vm1964_vm4, %v1954_v43 }
 0x1ea   : > { %v2099_v51 = vsel %vm2097_vm5, %v2090_v46, 0  ;;  %v2118_v52 = vsel %vm2097_vm5, %v2091_v47, 0 }
 0x1eb   : > { %2108 = vmatpush.bf16.msrb.mxu0 %v2099_v51  ;;  %2127 = vmatpush.bf16.msra.mxu1 %v2118_v52 }
 0x1ec   : > { %v1887_v53 = vpop.f32.mrf.mxu2  ;;  %v1948_v54 = vpop.f32.mrf.mxu3 }
 0x1ed   : > { %v1888_v56 = vadd.f32 %v4836_v49, %v1887_v53  ;;  %v1949_v57 = vadd.f32 %v4837_v50, %v1948_v54  ;;  %v1767_v58 = vpop.f32.mrf.mxu0  ;;  %v1828_v59 = vpop.f32.mrf.mxu1 }
 0x1ee   : > { %v4656_v59 = vld [vmem:[%s4987_s19] sm:$0xff] }
 0x1ef   : > { %v2092_v60 = vpack.c.bf16 %v1888_v56, %v1888_v56  ;;  %v2093_v61 = vpack.c.bf16 %v1949_v57, %v1949_v57  ;;  %2212 = vmatpush.bf16.msra.mxu0 %v4657_v42 }
 0x1f1   : > { %v2137_v63 = vsel %vm2097_vm5, %v2092_v60, 0  ;;  %v2156_v1 = vsel %vm2097_vm5, %v2093_v61, 0  ;;  %4035 = vmatmul.msk.bf16.vlgmr.msra.gmra.mxu3 %vm1964_vm4, %v1955_v62  ;;  %v4661_v60 = vld [vmem:[%s4987_s19 + $0x28] sm:$0xff]  ;;  %v4659_v61 = vld [vmem:[%s4987_s19 + $0x18] sm:$0xff]  ;;  %v4660_v62 = vld [vmem:[%s4987_s19 + $0x20] sm:$0xff] }
 0x1f2   : > { %2146 = vmatpush.bf16.msra.mxu2 %v2137_v63  ;;  %2165 = vmatpush.bf16.msrb.mxu3 %v2156_v1  ;;  %v4658_v63 = vld [vmem:[%s4987_s19 + $0x10] sm:$0xff]  ;;  %v4663_v1 = vld [vmem:[%s4987_s19 + $0x38] sm:$0xff] }
 0x1f3   : > { %2213 = vmatpush.bf16.msra.mxu0 %v4656_v59  ;;  %2240 = vmatpush.bf16.msrb.mxu1 %v4659_v61  ;;  %v4684_v59 = vld [vmem:[%s5007_s12 + $0xa4] sm:$0xf]  ;;  %v4160_v61 = vld [vmem:[%s5007_s12 + $0xb0] sm:$0xf0] }
 0x1f4   : > { %v1889_v2 = vpop.f32.mrf.mxu2  ;;  %v1950_v3 = vpop.f32.mrf.mxu3 }
 0x1f5   : > { %v4662_v2 = vld [vmem:[%s4987_s19 + $0x30] sm:$0xff] }
 0x1f6   : > { %2268 = vmatpush.bf16.msrb.mxu2 %v4661_v60  ;;  %2296 = vmatpush.bf16.msra.mxu3 %v4663_v1  ;;  %v4163_v1 = vor.u32 %v4684_v59, %v4160_v61  ;;  %v4086_v61 = vld [vmem:[%s5007_s12 + $0x8] sm:$0xf] }
 0x1f7   : > { %2241 = vmatpush.bf16.msrb.mxu1 %v4658_v63  ;;  %v4687_v63 = vld [vmem:[%s5007_s12 + $0xb4] sm:$0xf0] }
 0x1fa   : > { %2269 = vmatpush.bf16.msrb.mxu2 %v4660_v62  ;;  %2297 = vmatpush.bf16.msra.mxu3 %v4662_v2  ;;  %v4166_v62 = vld [vmem:[%s5007_s12 + $0xa8] sm:$0xf] }
 0x1fb   : > { %v4167_v2 = vor.u32 %v4687_v63, %v4166_v62  ;;  %v4667_v62 = vld [vmem:[%s5007_s12 + $0x14] sm:$0xf0]  ;;  %v4665_v63 = vld [vmem:[%s5007_s12 + $0xc] sm:$0xf] }
 0x25f   : > { %v1999_v0 = vpop.f32.mrf.mxu1 }
 0x260   : > { %v2000_v10 = vadd.f32 %v4823_v4, %v1999_v0 }
 0x262   : > { %v2045_v14 = vsel %vm2041_vm6, %v2000_v10, -inf }
 0x264   : > { %v1980_v5 = vpop.f32.mrf.mxu3 }
 0x265   : > { %v1981_v6 = vadd.f32 %v4823_v4, %v1980_v5 }
 0x267   : > { %v2001_v7 = vpop.f32.mrf.mxu1  ;;  %v2042_v8 = vsel %vm2041_vm6, %v1981_v6, -inf }
 0x268   : > { %2043 = vmax.xlane.f32.xlu2 %v2042_v8 }
 0x26b   : > { %v2018_v9 = vpop.f32.mrf.mxu2 }
 0x26c   : > { %v2019_v11 = vadd.f32 %v4823_v4, %v2018_v9  ;;  %v1982_v12 = vpop.f32.mrf.mxu3 }
 0x26e   : > { %v2048_v13 = vsel %vm2041_vm6, %v2019_v11, -inf }
 0x26f   : > { %2049 = vmax.xlane.f32.xlu1 %v2048_v13 }
 0x270   : > { %2046 = vmax.xlane.f32.xlu2 %v2045_v14 }
 0x273   : > { %v2020_v15 = vpop.f32.mrf.mxu2 }
 0x274   : > { %v2037_v16 = vpop.f32.mrf.mxu3 }
 0x275   : > { %v2038_v17 = vadd.f32 %v4823_v4, %v2037_v16 }
 0x277   : > { %v2051_v18 = vsel %vm2041_vm6, %v2038_v17, -inf }
 0x278   : > { %2052 = vmax.xlane.f32.xlu1 %v2051_v18 }
 0x27c   : > { %v2039_v19 = vpop.f32.mrf.mxu3 }
 0x2db   : > { %v2044_v20 = vpop.xlane.xlu2 %2043 }
 0x2dc   : > { %v2054_v21 = vsub.f32 %v1981_v6, %v2044_v20 }
 0x2de   : > { %v2058_v22 = vmul.f32 1.442695, %v2054_v21 }
 0x2e0   : > { %4848 = vpow2.f32 %v2058_v22  ;;  %v4838_v22 = vld [vmem:[%s4992_s24] ss:$0 sm:$0xff] }
 0x2e2   : > { %v2050_v23 = vpop.xlane.xlu1 %2049 }
 0x2e3   : > { %v2056_v24 = vsub.f32 %v2019_v11, %v2050_v23  ;;  %v2047_v25 = vpop.xlane.xlu2 %2046 }
 0x2e4   : > { %v2055_v28 = vsub.f32 %v2000_v10, %v2047_v25 }
 0x2e5   : > { %v2062_v27 = vmul.f32 1.442695, %v2056_v24 }
 0x2e6   : > { %v4849_v29 = vpop.eup %4848  ;;  %v2060_v31 = vmul.f32 1.442695, %v2055_v28 }
 0x2e7   : > { %4850 = vpow2.f32 %v2062_v27  ;;  %v2066_v30 = vsel %vm2041_vm6, %v4849_v29, 0.0 }
 0x2e8   : > { %2067 = vadd.xlane.f32.xlu2 %v2066_v30  ;;  %4852 = vpow2.f32 %v2060_v31  ;;  %v4694_v30 = vld [vmem:[%s5007_s12 + $0xec] sm:$0xf0]  ;;  %v4692_v31 = vld [vmem:[%s5007_s12 + $0xe4] sm:$0xf] }
 0x2eb   : > { %v2053_v34 = vpop.xlane.xlu1 %2052 }
 0x2ec   : > { %v2057_v35 = vsub.f32 %v2038_v17, %v2053_v34  ;;  %v4192_v34 = vld [vmem:[%s5007_s12 + $0xf0] sm:$0xf0] }
 0x2ed   : > { %v4851_v32 = vpop.eup %4850 }
 0x2ee   : > { %v2072_v36 = vsel %vm2041_vm6, %v4851_v32, 0.0  ;;  %v2064_v37 = vmul.f32 1.442695, %v2057_v35  ;;  %v4853_v38 = vpop.eup %4852  ;;  %v4198_v35 = vld [vmem:[%s5007_s12 + $0xe8] sm:$0xf] }
 0x2ef   : > { %2073 = vadd.xlane.f32.xlu0 %v2072_v36  ;;  %v2069_v39 = vsel %vm2041_vm6, %v4853_v38, 0.0  ;;  %v4695_v36 = vld [vmem:[%s5007_s12 + $0xf4] sm:$0xf0] }
 0x2f0   : > { %4854 = vpow2.f32 %v2064_v37  ;;  %v4195_v37 = vor.u32 %v4692_v31, %v4192_v34  ;;  %v4674_v31 = vld [vmem:[%s5007_s12 + $0x4c] sm:$0xf0] }
 0x2f6   : > { %v4855_v40 = vpop.eup %4854 }
 0x2f7   : > { %2070 = vadd.xlane.f32.xlu0 %v2069_v39  ;;  %v2075_v41 = vsel %vm2041_vm6, %v4855_v40, 0.0  ;;  %v4693_v39 = vld [vmem:[%s5007_s12 + $0xec] sm:$0xf] }
 0x2f8   : > { %2076 = vadd.xlane.f32.xlu1 %v2075_v41 }
 0x35b   : > { %v2068_v43 = vpop.xlane.xlu2 %2067 }
 0x35c   : > { %4856 = vrcp.f32 %v2068_v43 }
 0x362   : > { %v2074_v44 = vpop.xlane.xlu0 %2073  ;;  %v4857_v45 = vpop.eup %4856 }
 0x363   : > { %4858 = vrcp.f32 %v2074_v44  ;;  %v2082_v46 = vmul.f32 %v4857_v45, %v4849_v29  ;;  %v4190_v29 = vld [vmem:[%s5007_s12 + $0xe0] sm:$0xf] }
 0x364   : > { %v4174_v45 = vld [vmem:[%s5007_s12 + $0xc0] sm:$0xf] }
 0x365   : > { %v2086_v47 = vpack.c.bf16 %v2082_v46, %v2082_v46  ;;  %v4690_v46 = vld [vmem:[%s5007_s12 + $0xcc] sm:$0xf0] }
 0x367   : > { %4036 = vmatmul.msk.bf16.vlgmr.msrb.gmra.mxu0 %vm2041_vm6, %v2086_v47  ;;  %v4688_v47 = vld [vmem:[%s5007_s12 + $0xc4] sm:$0xf] }
 0x369   : > { %v4859_v48 = vpop.eup %4858 }
 0x36a   : > { %v2084_v49 = vmul.f32 %v4859_v48, %v4851_v32  ;;  %v2071_v50 = vpop.xlane.xlu0 %2070  ;;  %v4191_v32 = vor.u32 %v4694_v30, %v4190_v29  ;;  %v4175_v48 = vor.u32 %v4690_v46, %v4174_v45  ;;  %v4110_v30 = vld [vmem:[%s5007_s12 + $0x40] sm:$0xf]  ;;  %v4668_v45 = vld [vmem:[%s5007_s12 + $0x24] sm:$0xf] }
 0x36b   : > { %4860 = vrcp.f32 %v2071_v50  ;;  %v2077_v52 = vpop.xlane.xlu1 %2076  ;;  %v4182_v50 = vld [vmem:[%s5007_s12 + $0xc8] sm:$0xf]  ;;  %v4111_v34 = vor.u32 %v4674_v31, %v4110_v30  ;;  %v4708_v30 = vld [vmem:[%s5017_s27 + $0x60] sm:$0xff] }
 0x36c   : > { %v2088_v51 = vpack.c.bf16 %v2084_v49, %v2084_v49  ;;  %4862 = vrcp.f32 %v2077_v52  ;;  %2545 = vmatpush.bf16.msrb.mxu0 %v4191_v32  ;;  %v4176_v49 = vld [vmem:[%s5007_s12 + $0xd0] sm:$0xf0]  ;;  %v4672_v32 = vld [vmem:[%s5007_s12 + $0x44] sm:$0xf]  ;;  %v4717_v31 = vld [vmem:[%s5017_s27 + $0xa8] sm:$0xff] }
 0x36d   : > { %v4179_v52 = vor.u32 %v4688_v47, %v4176_v49  ;;  %v4096_v47 = vld [vmem:[%s5007_s12 + $0x30] sm:$0xf0]  ;;  %v4671_v49 = vld [vmem:[%s5007_s12 + $0x34] sm:$0xf0] }
 0x36e   : > { %4038 = vmatmul.msk.bf16.vlgmr.msra.gmra.mxu2 %vm2041_vm6, %v2088_v51  ;;  %v4691_v51 = vld [vmem:[%s5007_s12 + $0xd4] sm:$0xf0] }
 0x370   : > { %2546 = vmatpush.bf16.msrb.mxu0 %v4175_v48  ;;  %v4102_v48 = vld [vmem:[%s5007_s12 + $0x28] sm:$0xf] }
 0x371   : > { %v4861_v53 = vpop.eup %4860 }
 0x372   : > { %v2083_v54 = vmul.f32 %v4861_v53, %v4853_v38  ;;  %v4863_v55 = vpop.eup %4862  ;;  %v4199_v38 = vor.u32 %v4695_v36, %v4198_v35  ;;  %v4183_v53 = vor.u32 %v4691_v51, %v4182_v50  ;;  %v4112_v35 = vld [vmem:[%s5007_s12 + $0x50] sm:$0xf0]  ;;  %v4118_v36 = vld [vmem:[%s5007_s12 + $0x48] sm:$0xf]  ;;  %v4099_v50 = vor.u32 %v4668_v45, %v4096_v47  ;;  %v4704_v47 = vld [vmem:[%s5017_s27 + $0x40] sm:$0xff] }
 0x373   : > { %v2085_v57 = vmul.f32 %v4863_v55, %v4855_v40  ;;  %v4200_v40 = vld [vmem:[%s5007_s12 + $0xf8] sm:$0xf0]  ;;  %v4103_v51 = vor.u32 %v4671_v49, %v4102_v48  ;;  %v4722_v45 = vld [vmem:[%s5017_s27 + $0xd0] sm:$0xff]  ;;  %v4713_v48 = vld [vmem:[%s5017_s27 + $0x88] sm:$0xff] }
 0x374   : > { %v2087_v56 = vpack.c.bf16 %v2083_v54, %v2083_v54  ;;  %2571 = vmatpush.bf16.msra.mxu2 %v4199_v38  ;;  %v4689_v54 = vld [vmem:[%s5007_s12 + $0xcc] sm:$0xf]  ;;  %v4184_v55 = vld [vmem:[%s5007_s12 + $0xd8] sm:$0xf0]  ;;  %v4115_v38 = vor.u32 %v4672_v32, %v4112_v35 }
 0x375   : > { %v2089_v58 = vpack.c.bf16 %v2085_v57, %v2085_v57  ;;  %v4158_v57 = vld [vmem:[%s5007_s12 + $0xa0] sm:$0xf]  ;;  %v4725_v32 = vld [vmem:[%s5017_s27 + $0xe8] sm:$0xff]  ;;  %v4707_v35 = vld [vmem:[%s5017_s27 + $0x58] sm:$0xff] }
 0x376   : > { %4037 = vmatmul.msk.bf16.vlgmr.msra.gmra.mxu1 %vm2041_vm6, %v2087_v56  ;;  %v4187_v56 = vor.u32 %v4689_v54, %v4184_v55  ;;  %v4078_v54 = vld [vmem:[%s5007_s12] sm:$0xf]  ;;  %v4721_v49 = vld [vmem:[%s5017_s27 + $0xc8] sm:$0xff] }
 0x377   : > { %4039 = vmatmul.msk.bf16.vlgmr.msrb.gmra.mxu3 %vm2041_vm6, %v2089_v58  ;;  %2558 = vmatpush.bf16.msra.mxu1 %v4195_v37  ;;  %v4686_v58 = vld [vmem:[%s5007_s12 + $0xac] sm:$0xf0]  ;;  %v4675_v37 = vld [vmem:[%s5007_s12 + $0x54] sm:$0xf0] }
 0x378   : > { %2572 = vmatpush.bf16.msra.mxu2 %v4183_v53  ;;  %v4159_v60 = vor.u32 %v4686_v58, %v4158_v57  ;;  %v4104_v53 = vld [vmem:[%s5007_s12 + $0x38] sm:$0xf0]  ;;  %v4664_v57 = vld [vmem:[%s5007_s12 + $0x4] sm:$0xf]  ;;  %v4080_v58 = vld [vmem:[%s5007_s12 + $0x10] sm:$0xf0] }
 0x37a   : > { %2547 = vmatpush.bf16.msrb.mxu0 %v4159_v60  ;;  %v4083_v60 = vor.u32 %v4664_v57, %v4080_v58 }
 0x37b   : > { %2559 = vmatpush.bf16.msra.mxu1 %v4179_v52  ;;  %v4669_v52 = vld [vmem:[%s5007_s12 + $0x2c] sm:$0xf] }
 0x37c   : > { %2573 = vmatpush.bf16.msra.mxu2 %v4167_v2  ;;  %v4107_v55 = vor.u32 %v4669_v52, %v4104_v53  ;;  %v4088_v2 = vld [vmem:[%s5007_s12 + $0x18] sm:$0xf0]  ;;  %v4712_v53 = vld [vmem:[%s5017_s27 + $0x80] sm:$0xff] }
 0x37f   : > { %2560 = vmatpush.bf16.msra.mxu1 %v4163_v1  ;;  %v4087_v1 = vor.u32 %v4667_v62, %v4086_v61 }
 0x3e4   : > { %v2110_v3 = vpop.f32.mrf.mxu0 }
 0x3e5   : > { %v2171_v0 = vpack.c.bf16 %v2110_v3, %v2110_v3  ;;  %v4685_v3 = vld [vmem:[%s5007_s12 + $0xac] sm:$0xf] }
 0x3e7   : > { %4048 = vmatmul.msk.bf16.vlgmr.msra.gmra.mxu0 %vm1964_vm4, %v2171_v0  ;;  %v4168_v0 = vld [vmem:[%s5007_s12 + $0xb8] sm:$0xf0] }
 0x3ec   : > { %v2112_v4 = vpop.f32.mrf.mxu0 }
 0x3ed   : > { %v4171_v4 = vor.u32 %v4685_v3, %v4168_v0  ;;  %v4091_v3 = vor.u32 %v4665_v63, %v4088_v2 }
 0x3f1   : > { %v2148_v5 = vpop.f32.mrf.mxu2 }
 0x3f2   : > { %v2173_v6 = vpack.c.bf16 %v2148_v5, %v2148_v5  ;;  %v4142_v5 = vld [vmem:[%s5007_s12 + $0x80] sm:$0xf] }
 0x3f3   : > { %v2129_v7 = vpop.f32.mrf.mxu1 }
 0x3f4   : > { %v2172_v8 = vpack.c.bf16 %v2129_v7, %v2129_v7  ;;  %4066 = vmatmul.msk.bf16.vlgmr.msrb.gmra.mxu2 %vm1964_vm4, %v2173_v6  ;;  %v4682_v6 = vld [vmem:[%s5007_s12 + $0x8c] sm:$0xf0]  ;;  %v4680_v7 = vld [vmem:[%s5007_s12 + $0x84] sm:$0xf] }
 0x3f6   : > { %4057 = vmatmul.msk.bf16.vlgmr.msrb.gmra.mxu1 %vm1964_vm4, %v2172_v8  ;;  %v4143_v8 = vor.u32 %v4682_v6, %v4142_v5  ;;  %v4711_v5 = vld [vmem:[%s5017_s27 + $0x78] sm:$0xff] }
 0x3f8   : > { %2548 = vmatpush.bf16.msrb.mxu0 %v4143_v8 }
 0x3f9   : > { %v2150_v9 = vpop.f32.mrf.mxu2 }
 0x3fa   : > { %v2167_v11 = vpop.f32.mrf.mxu3  ;;  %v4144_v9 = vld [vmem:[%s5007_s12 + $0x90] sm:$0xf0] }
 0x3fb   : > { %v2131_v10 = vpop.f32.mrf.mxu1  ;;  %v2174_v12 = vpack.c.bf16 %v2167_v11, %v2167_v11  ;;  %v4683_v11 = vld [vmem:[%s5007_s12 + $0x94] sm:$0xf0] }
 0x3fc   : > { %v4150_v10 = vld [vmem:[%s5007_s12 + $0x88] sm:$0xf] }
 0x3fd   : > { %4075 = vmatmul.msk.bf16.vlgmr.msra.gmra.mxu3 %vm1964_vm4, %v2174_v12  ;;  %v4147_v12 = vor.u32 %v4680_v7, %v4144_v9 }
 0x3ff   : > { %2561 = vmatpush.bf16.msra.mxu1 %v4147_v12 }
 0x402   : > { %v2169_v13 = vpop.f32.mrf.mxu3 }
 0x403   : > { %v4151_v13 = vor.u32 %v4683_v11, %v4150_v10 }
 0x405   : > { %2574 = vmatpush.bf16.msra.mxu2 %v4151_v13 }
 0x464   : > { %v2215_v14 = vpop.f32.mrf.mxu0 }
 0x46c   : > { %v2217_v15 = vpop.f32.mrf.mxu0 }
 0x46d   : > { %v4152_v15 = vld [vmem:[%s5007_s12 + $0x98] sm:$0xf0] }
 0x473   : > { %v2243_v16 = vpop.f32.mrf.mxu1 }
 0x474   : > { %v2303_v19 = vadd.f32 %v2243_v16, %v2215_v14  ;;  %v4681_v14 = vld [vmem:[%s5007_s12 + $0x8c] sm:$0xf] }
 0x475   : > { %v4155_v16 = vor.u32 %v4681_v14, %v4152_v15  ;;  %v4839_v14 = vld [vmem:[%s5520_s23] ss:$0 sm:$0xff]  ;;  %s5530_s23 = sld [smem:[#allocation14_spill]] }
 0x477   : > { %v2271_v17 = vpop.f32.mrf.mxu2 }
 0x478   : > { %v2304_v21 = vadd.f32 %v2303_v19, %v2271_v17  ;;  %v4126_v17 = vld [vmem:[%s5007_s12 + $0x60] sm:$0xf]  ;;  %v4676_v19 = vld [vmem:[%s5007_s12 + $0x64] sm:$0xf] }
 0x47b   : > { %v2245_v18 = vpop.f32.mrf.mxu1 }
 0x47c   : > { %v4678_v18 = vld [vmem:[%s5007_s12 + $0x6c] sm:$0xf0] }
 0x47f   : > { %v2273_v20 = vpop.f32.mrf.mxu2 }
 0x480   : > { %v2299_v23 = vpop.f32.mrf.mxu3  ;;  %v4127_v20 = vor.u32 %v4678_v18, %v4126_v17  ;;  %v4840_v17 = vld [vmem:[%s5521_s26] ss:$0 sm:$0xff]  ;;  %s5531_s26 = sld [smem:[#allocation11_spill]] }
 0x481   : > { %v2305_v24 = vadd.f32 %v2304_v21, %v2299_v23  ;;  %v4128_v21 = vld [vmem:[%s5007_s12 + $0x70] sm:$0xf0]  ;;  %v4679_v23 = vld [vmem:[%s5007_s12 + $0x74] sm:$0xf0] }
 0x482   : > { %2549 = vmatpush.bf16.msrb.mxu0 %v4127_v20 }
 0x483   : > { %v2310_v25 = vadd.f32 %v4838_v22, %v2305_v24  ;;  %v4134_v22 = vld [vmem:[%s5007_s12 + $0x68] sm:$0xf]  ;;  %v4131_v24 = vor.u32 %v4676_v19, %v4128_v21  ;;  %v4702_v21 = vld [vmem:[%s5017_s27 + $0x30] sm:$0xff] }
 0x485   : > { %v2311_v27 = vadd.f32 %v2310_v25, %v5184_v26  ;;  %v4203_v26 = vor.u32 %v4693_v39, %v4200_v40  ;;  %v4135_v25 = vor.u32 %v4679_v23, %v4134_v22  ;;  %2562 = vmatpush.bf16.msra.mxu1 %v4131_v24  ;;  %v4119_v39 = vor.u32 %v4675_v37, %v4118_v36  ;;  %v4673_v40 = vld [vmem:[%s5007_s12 + $0x4c] sm:$0xf]  ;;  %v4710_v22 = vld [vmem:[%s5017_s27 + $0x70] sm:$0xff]  ;;  %v4727_v23 = vld [vmem:[%s5017_s27 + $0xf8] sm:$0xff] }
 0x486   : > { %2550 = vmatpush.bf16.msrb.mxu0 %v4111_v34  ;;  %v4701_v24 = vld [vmem:[%s5017_s27 + $0x28] sm:$0xff]  ;;  %v4699_v34 = vld [vmem:[%s5017_s27 + $0x18] sm:$0xff]  ;;  %v4716_v36 = vld [vmem:[%s5017_s27 + $0xa0] sm:$0xff] }
 0x487   : > { %2314 = vadd.xlane.f32.xlu1 %v2311_v27  ;;  %2584 = vmatpush.bf16.msrb.mxu3 %v4203_v26  ;;  %v4120_v26 = vld [vmem:[%s5007_s12 + $0x58] sm:$0xf0]  ;;  %v4724_v37 = vld [vmem:[%s5017_s27 + $0xe0] sm:$0xff] }
 0x488   : > { %v2301_v28 = vpop.f32.mrf.mxu3  ;;  %2575 = vmatpush.bf16.msra.mxu2 %v4135_v25  ;;  %v4709_v25 = vld [vmem:[%s5017_s27 + $0x68] sm:$0xff] }
 0x489   : > { %v4136_v28 = vld [vmem:[%s5007_s12 + $0x78] sm:$0xf0]  ;;  %2563 = vmatpush.bf16.msra.mxu1 %v4115_v38  ;;  %v4698_v38 = vld [vmem:[%s5017_s27 + $0x10] sm:$0xff] }
 0x48b   : > { %2585 = vmatpush.bf16.msrb.mxu3 %v4187_v56  ;;  %v4666_v56 = vld [vmem:[%s5007_s12 + $0xc] sm:$0xf0] }
 0x48c   : > { %2576 = vmatpush.bf16.msra.mxu2 %v4119_v39  ;;  %v4079_v59 = vor.u32 %v4666_v56, %v4078_v54  ;;  %v4706_v39 = vld [vmem:[%s5017_s27 + $0x50] sm:$0xff]  ;;  %v4720_v54 = vld [vmem:[%s5017_s27 + $0xc0] sm:$0xff] }
 0x48d   : > { %2564 = vmatpush.bf16.msra.mxu1 %v4099_v50  ;;  %v2375_v50 = vld [vmem:[%s5522_s28] sm:$0xf]  ;;  %s5532_s28 = sld [smem:[#allocation13_spill]] }
 0x48e   : > { %v2378_v52 = vperm.slane %v2375_v50, 1  ;;  %v2379_v61 = vperm.slane %v2375_v50, 2  ;;  %v2380_v62 = vperm.slane %v2375_v50, 3 }
 0x48f   : > { %2586 = vmatpush.bf16.msrb.mxu3 %v4171_v4  ;;  %v4703_v4 = vld [vmem:[%s5017_s27 + $0x38] sm:$0xff] }
 0x490   : > { %2577 = vmatpush.bf16.msra.mxu2 %v4103_v51  ;;  %v2377_v51 = vperm.slane %v2375_v50, 0 }
 0x491   : > { %2565 = vmatpush.bf16.msra.mxu1 %v4083_v60 }
 0x493   : > { %2587 = vmatpush.bf16.msrb.mxu3 %v4155_v16 }
 0x494   : > { %2578 = vmatpush.bf16.msra.mxu2 %v4087_v1 }
 0x495   : > { %2910 = vmatpush.bf16.msrb.mxu1 %v4711_v5 }
 0x499   : > { %2911 = vmatpush.bf16.msrb.mxu1 %v4710_v22 }
 0x49d   : > { %2912 = vmatpush.bf16.msrb.mxu1 %v4709_v25 }
 0x4a1   : > { %2913 = vmatpush.bf16.msrb.mxu1 %v4708_v30 }
 0x4a5   : > { %2914 = vmatpush.bf16.msrb.mxu1 %v4707_v35 }
 0x4a9   : > { %2915 = vmatpush.bf16.msrb.mxu1 %v4706_v39 }
 0x4fa   : > { %v2315_v41 = vpop.xlane.xlu1 %2314 }
 0x4fb   : > { %v2316_v42 = vmul.f32 %v2315_v41, %v5134_v33  ;;  %v4123_v41 = vor.u32 %v4673_v40, %v4120_v26  ;;  %v4715_v40 = vld [vmem:[%s5017_s27 + $0x98] sm:$0xff] }
 0x4fc   : > { %v4723_v26 = vld [vmem:[%s5017_s27 + $0xd8] sm:$0xff] }
 0x4fd   : > { %v5299_v43 = vsub.f32 %v2311_v27, %v2316_v42  ;;  %v4677_v27 = vld [vmem:[%s5007_s12 + $0x6c] sm:$0xf]  ;;  %v4094_v42 = vld [vmem:[%s5007_s12 + $0x20] sm:$0xf] }
 0x4fe   : > { %v4139_v29 = vor.u32 %v4677_v27, %v4136_v28  ;;  %v4718_v27 = vld [vmem:[%s5017_s27 + $0xb0] sm:$0xff] }
 0x4ff   : > { %v2318_v44 = vmul.f32 %v5299_v43, %v5299_v43  ;;  %v4726_v28 = vld [vmem:[%s5017_s27 + $0xf0] sm:$0xff] }
 0x500   : > { %2588 = vmatpush.bf16.msrb.mxu3 %v4139_v29  ;;  %v4700_v29 = vld [vmem:[%s5017_s27 + $0x20] sm:$0xff] }
 0x501   : > { %2319 = vadd.xlane.f32.xlu2 %v2318_v44  ;;  %v4670_v44 = vld [vmem:[%s5007_s12 + $0x2c] sm:$0xf0] }
 0x502   : > { %v4095_v46 = vor.u32 %v4670_v44, %v4094_v42  ;;  %v4705_v42 = vld [vmem:[%s5017_s27 + $0x48] sm:$0xff]  ;;  %v4714_v44 = vld [vmem:[%s5017_s27 + $0x90] sm:$0xff] }
 0x503   : > { %2916 = vmatpush.bf16.msrb.mxu1 %v4705_v42 }
 0x504   : > { %2589 = vmatpush.bf16.msrb.mxu3 %v4123_v41  ;;  %2551 = vmatpush.bf16.msrb.mxu0 %v4095_v46  ;;  %v4697_v41 = vld [vmem:[%s5017_s27 + $0x8] sm:$0xff]  ;;  %v4696_v46 = vld [vmem:[%s5017_s27] sm:$0xff] }
 0x507   : > { %2917 = vmatpush.bf16.msrb.mxu1 %v4704_v47 }
 0x508   : > { %2590 = vmatpush.bf16.msrb.mxu3 %v4107_v55  ;;  %2552 = vmatpush.bf16.msrb.mxu0 %v4079_v59 }
 0x50c   : > { %2591 = vmatpush.bf16.msrb.mxu3 %v4091_v3  ;;  %2897 = vmatpush.bf16.msra.mxu0 %v4703_v4 }
 0x510   : > { %2898 = vmatpush.bf16.msra.mxu0 %v4702_v21  ;;  %2936 = vmatpush.bf16.msra.mxu3 %v4727_v23 }
 0x514   : > { %2899 = vmatpush.bf16.msra.mxu0 %v4701_v24  ;;  %2937 = vmatpush.bf16.msra.mxu3 %v4726_v28 }
 0x518   : > { %2900 = vmatpush.bf16.msra.mxu0 %v4700_v29  ;;  %2938 = vmatpush.bf16.msra.mxu3 %v4725_v32 }
 0x51c   : > { %2901 = vmatpush.bf16.msra.mxu0 %v4699_v34  ;;  %2939 = vmatpush.bf16.msra.mxu3 %v4724_v37 }
 0x520   : > { %2902 = vmatpush.bf16.msra.mxu0 %v4698_v38  ;;  %2940 = vmatpush.bf16.msra.mxu3 %v4723_v26 }
 0x524   : > { %2903 = vmatpush.bf16.msra.mxu0 %v4697_v41  ;;  %2941 = vmatpush.bf16.msra.mxu3 %v4722_v45 }
 0x528   : > { %2904 = vmatpush.bf16.msra.mxu0 %v4696_v46  ;;  %2942 = vmatpush.bf16.msra.mxu3 %v4721_v49  ;;  %v4841_v49 = vld [vmem:[%s5523_s1] ss:$0 sm:$0xff]  ;;  %s939_s1 = scalar_lea.vmem %s5087_s6, %s3646_s0 }
 0x52c   : > { %2943 = vmatpush.bf16.msra.mxu3 %v4720_v54 }
 0x574   : > { %v2320_v0 = vpop.xlane.xlu2 %2319 }
 0x575   : > { %v2321_v6 = vmul.f32 %v2320_v0, %v5134_v33 }
 0x577   : > { %v2322_v7 = vadd.f32 1e-05, %v2321_v6 }
 0x579   : > { %4864 = vrsqrt.f32 %v2322_v7  ;;  %vm2329_vm8 = vweird.f32 %v2322_v7 }
 0x57f   : > { %v4865_v8 = vpop.eup %4864 }
 0x580   : > { %v2324_v9 = vmul.f32 %v4865_v8, %v2322_v7  ;;  %vm2330_vm7 = vweird.f32 %v4865_v8 }
 0x581   : > { %vm2331_vm9 = vmor %vm2329_vm8, %vm2330_vm7 }
 0x582   : > { %v2325_v10 = vmul.f32 %v4865_v8, %v2324_v9 }
 0x584   : > { %v2326_v11 = vmul.f32 0.5, %v2325_v10 }
 0x586   : > { %v2327_v12 = vsub.f32 1.5, %v2326_v11 }
 0x588   : > { %v2328_v13 = vmul.f32 %v4865_v8, %v2327_v12 }
 0x58a   : > { %v2332_v15 = vsel %vm2331_vm9, %v4865_v8, %v2328_v13 }
 0x58b   : > { %v2333_v16 = vmul.f32 %v2332_v15, %v5299_v43  ;;  %v4719_v43 = vld [vmem:[%s5017_s27 + $0xb8] sm:$0xff] }
 0x58c   : > { %2923 = vmatpush.bf16.msrb.mxu2 %v4719_v43 }
 0x58d   : > { %v2337_v18 = vmul.f32 %v4839_v14, %v2333_v16 }
 0x58f   : > { %v5365_v19 = vadd.f32 %v4840_v17, %v2337_v18 }
 0x590   : > { %2924 = vmatpush.bf16.msrb.mxu2 %v4718_v27 }
 0x591   : > { %v2342_v20 = vpack.c.bf16 %v5365_v19, %v5365_v19 }
 0x593   : > { %2553 = vmatmul.bf16.vlgmr.msrb.gmra.mxu0 %v2342_v20  ;;  %2566 = vmatmul.bf16.vlgmr.msra.gmra.mxu1 %v2342_v20 }
 0x594   : > { %2579 = vmatmul.bf16.vlgmr.msra.gmra.mxu2 %v2342_v20  ;;  %2592 = vmatmul.bf16.vlgmr.msrb.gmra.mxu3 %v2342_v20 }
 0x595   : > { %2925 = vmatpush.bf16.msrb.mxu2 %v4717_v31 }
 0x599   : > { %2926 = vmatpush.bf16.msrb.mxu2 %v4716_v36 }
 0x59d   : > { %2927 = vmatpush.bf16.msrb.mxu2 %v4715_v40 }
 0x5a1   : > { %2928 = vmatpush.bf16.msrb.mxu2 %v4714_v44 }
 0x5a5   : > { %2929 = vmatpush.bf16.msrb.mxu2 %v4713_v48 }
 0x5a9   : > { %2930 = vmatpush.bf16.msrb.mxu2 %v4712_v53 }
 0x610   : > { %v2554_v55 = vpop.f32.mrf.mxu0  ;;  %v2567_v56 = vpop.f32.mrf.mxu1 }
 0x611   : > { %v2555_v57 = vadd.f32 %v2554_v55, %v2377_v51  ;;  %v2568_v58 = vadd.f32 %v2567_v56, %v2378_v52 }
 0x613   : > { %v2597_v59 = vmul.f32 %v2555_v57, %v2555_v57  ;;  %v2598_v60 = vmul.f32 %v2568_v58, %v2568_v58 }
 0x615   : > { %v2601_v63 = vmul.f32 %v2597_v59, %v2555_v57  ;;  %v2602_v1 = vmul.f32 %v2598_v60, %v2568_v58 }
 0x617   : > { %v2605_v2 = vmul.f32 0.044715, %v2601_v63  ;;  %v2606_v3 = vmul.f32 0.044715, %v2602_v1  ;;  %v2580_v0 = vpop.f32.mrf.mxu2  ;;  %v2593_v4 = vpop.f32.mrf.mxu3  ;;  %v4422_v63 = vld [vmem:[%s5524_s2 + $0xe8] sm:$0xf] }
 0x618   : > { %v2581_v5 = vadd.f32 %v2580_v0, %v2379_v61  ;;  %v2594_v6 = vadd.f32 %v2593_v4, %v2380_v62  ;;  %v2556_v7 = vpop.f32.mrf.mxu0  ;;  %v2569_v8 = vpop.f32.mrf.mxu1  ;;  %v4418_v61 = vld [vmem:[%s5524_s2 + $0xe0] sm:$0xf]  ;;  %v4750_v62 = vld [vmem:[%s5524_s2 + $0xec] sm:$0xf0]  ;;  %v4424_v0 = vld [vmem:[%s5524_s2 + $0xf8] sm:$0xf0] }
 0x619   : > { %v2609_v9 = vadd.f32 %v2605_v2, %v2555_v57  ;;  %v2610_v10 = vadd.f32 %v2606_v3, %v2568_v58  ;;  %v4419_v1 = vor.u32 %v4750_v62, %v4418_v61  ;;  %v4751_v2 = vld [vmem:[%s5524_s2 + $0xf4] sm:$0xf0]  ;;  %v4749_v3 = vld [vmem:[%s5524_s2 + $0xec] sm:$0xf]  ;;  %v4352_v62 = vld [vmem:[%s5524_s2 + $0x38] sm:$0xf0] }
 0x61a   : > { %v2599_v11 = vmul.f32 %v2581_v5, %v2581_v5  ;;  %v2600_v12 = vmul.f32 %v2594_v6, %v2594_v6  ;;  %v4423_v4 = vor.u32 %v4751_v2, %v4422_v63  ;;  %v4731_v61 = vld [vmem:[%s5524_s2 + $0x2c] sm:$0xf]  ;;  %v4334_v2 = vld [vmem:[%s5524_s2] sm:$0xf] }
 0x61b   : > { %v2613_v13 = vmul.f32 0.7978846, %v2609_v9  ;;  %v2614_v14 = vmul.f32 0.7978846, %v2610_v10  ;;  %3149 = vmatpush.bf16.msrb.mxu0 %v4419_v1  ;;  %v4406_v9 = vld [vmem:[%s5524_s2 + $0xc0] sm:$0xf]  ;;  %v4355_v1 = vor.u32 %v4731_v61, %v4352_v62 }
 0x61c   : > { %v2603_v15 = vmul.f32 %v2599_v11, %v2581_v5  ;;  %v2604_v16 = vmul.f32 %v2600_v12, %v2594_v6  ;;  %3162 = vmatpush.bf16.msra.mxu1 %v4423_v4  ;;  %v4747_v10 = vld [vmem:[%s5524_s2 + $0xcc] sm:$0xf0]  ;;  %v4410_v11 = vld [vmem:[%s5524_s2 + $0xc8] sm:$0xf] }
 0x61d   : > { %4866 = vtanh.f32 %v2613_v13  ;;  %v4407_v12 = vor.u32 %v4747_v10, %v4406_v9  ;;  %v4748_v13 = vld [vmem:[%s5524_s2 + $0xd4] sm:$0xf0] }
 0x61e   : > { %4868 = vtanh.f32 %v2614_v14  ;;  %v2607_v17 = vmul.f32 0.044715, %v2603_v15  ;;  %v2608_v18 = vmul.f32 0.044715, %v2604_v16  ;;  %v4746_v14 = vld [vmem:[%s5524_s2 + $0xcc] sm:$0xf]  ;;  %v4411_v16 = vor.u32 %v4748_v13, %v4410_v11 }
 0x61f   : > { %v2582_v20 = vpop.f32.mrf.mxu2  ;;  %v2595_v21 = vpop.f32.mrf.mxu3  ;;  %v4412_v15 = vld [vmem:[%s5524_s2 + $0xd8] sm:$0xf0]  ;;  %3150 = vmatpush.bf16.msrb.mxu0 %v4407_v12 }
 0x620   : > { %v2611_v22 = vadd.f32 %v2607_v17, %v2581_v5  ;;  %v2612_v43 = vadd.f32 %v2608_v18, %v2594_v6  ;;  %v4415_v17 = vor.u32 %v4746_v14, %v4412_v15  ;;  %3163 = vmatpush.bf16.msra.mxu1 %v4411_v16  ;;  %v4394_v18 = vld [vmem:[%s5524_s2 + $0xa0] sm:$0xf]  ;;  %v4744_v20 = vld [vmem:[%s5524_s2 + $0xac] sm:$0xf0]  ;;  %v4398_v21 = vld [vmem:[%s5524_s2 + $0xa8] sm:$0xf] }
 0x622   : > { %v2615_v23 = vmul.f32 0.7978846, %v2611_v22  ;;  %v2616_v24 = vmul.f32 0.7978846, %v2612_v43  ;;  %v4395_v22 = vor.u32 %v4744_v20, %v4394_v18  ;;  %v4745_v43 = vld [vmem:[%s5524_s2 + $0xb4] sm:$0xf0] }
 0x623   : > { %v4867_v25 = vpop.eup %4866  ;;  %v4842_v20 = vld [vmem:[%s5525_s7] ss:$0 sm:$0xff] }
 0x624   : > { %v4869_v27 = vpop.eup %4868  ;;  %4870 = vtanh.f32 %v2615_v23  ;;  %v2621_v28 = vadd.f32 1.0, %v4867_v25  ;;  %v4743_v23 = vld [vmem:[%s5524_s2 + $0xac] sm:$0xf]  ;;  %v4399_v25 = vor.u32 %v4745_v43, %v4398_v21  ;;  %3151 = vmatpush.bf16.msrb.mxu0 %v4395_v22  ;;  %v4843_v22 = vld [vmem:[%s5526_s10] ss:$0 sm:$0xff] }
 0x625   : > { %4872 = vtanh.f32 %v2616_v24  ;;  %v2622_v29 = vadd.f32 1.0, %v4869_v27  ;;  %v4400_v24 = vld [vmem:[%s5524_s2 + $0xb8] sm:$0xf0] }
 0x626   : > { %v2625_v30 = vmul.f32 0.5, %v2621_v28  ;;  %v4403_v27 = vor.u32 %v4743_v23, %v4400_v24  ;;  %3164 = vmatpush.bf16.msra.mxu1 %v4399_v25  ;;  %v4382_v28 = vld [vmem:[%s5524_s2 + $0x80] sm:$0xf]  ;;  %v4759_v25 = vld [vmem:[%s5527_s11 + $0x38] sm:$0xff] }
 0x627   : > { %v2626_v31 = vmul.f32 0.5, %v2622_v29  ;;  %v4741_v29 = vld [vmem:[%s5524_s2 + $0x8c] sm:$0xf0]  ;;  %3296 = vmatpush.bf16.msrb.mxu3 %v4759_v25  ;;  %v4771_v25 = vld [vmem:[%s5530_s23 + $0x18] sm:$0xff] }
 0x628   : > { %v2629_v32 = vmul.f32 %v2625_v30, %v2555_v57  ;;  %v4386_v30 = vld [vmem:[%s5524_s2 + $0x88] sm:$0xf] }
 0x629   : > { %v2630_v34 = vmul.f32 %v2626_v31, %v2568_v58  ;;  %v4383_v31 = vor.u32 %v4741_v29, %v4382_v28  ;;  %v4757_v28 = vld [vmem:[%s5527_s11 + $0x28] sm:$0xff]  ;;  %v4756_v29 = vld [vmem:[%s5527_s11 + $0x20] sm:$0xff] }
 0x62a   : > { %v4871_v35 = vpop.eup %4870  ;;  %v2633_v36 = vpack.c.bf16 %v2629_v32, %v2629_v32  ;;  %v4742_v32 = vld [vmem:[%s5524_s2 + $0x94] sm:$0xf0] }
 0x62b   : > { %v4873_v37 = vpop.eup %4872  ;;  %v2634_v38 = vpack.c.bf16 %v2630_v34, %v2630_v34  ;;  %v2623_v39 = vadd.f32 1.0, %v4871_v35  ;;  %v4740_v34 = vld [vmem:[%s5524_s2 + $0x8c] sm:$0xf]  ;;  %v4388_v35 = vld [vmem:[%s5524_s2 + $0x98] sm:$0xf0]  ;;  %3152 = vmatpush.bf16.msrb.mxu0 %v4383_v31 }
 0x62c   : > { %2905 = vmatmul.bf16.vlgmr.msra.gmra.mxu0 %v2633_v36  ;;  %v2624_v40 = vadd.f32 1.0, %v4873_v37  ;;  %v4387_v36 = vor.u32 %v4742_v32, %v4386_v30  ;;  %v4391_v37 = vor.u32 %v4740_v34, %v4388_v35  ;;  %v3013_v30 = vld [vmem:[%s5528_s18] sm:$0xf]  ;;  %v4754_v35 = vld [vmem:[%s5527_s11 + $0x10] sm:$0xff] }
 0x62d   : > { %2918 = vmatmul.bf16.vlgmr.msrb.gmra.mxu1 %v2634_v38  ;;  %v2627_v26 = vmul.f32 0.5, %v2623_v39  ;;  %v4370_v38 = vld [vmem:[%s5524_s2 + $0x60] sm:$0xf]  ;;  %v4738_v39 = vld [vmem:[%s5524_s2 + $0x6c] sm:$0xf0]  ;;  %v3143_v31 = vperm.slane %v3013_v30, 0 }
 0x62e   : > { %v2628_v41 = vmul.f32 0.5, %v2624_v40  ;;  %3165 = vmatpush.bf16.msra.mxu1 %v4387_v36  ;;  %v4374_v40 = vld [vmem:[%s5524_s2 + $0x68] sm:$0xf] }
 0x62f   : > { %v2631_v42 = vmul.f32 %v2627_v26, %v2581_v5  ;;  %v4427_v5 = vor.u32 %v4749_v3, %v4424_v0  ;;  %v4371_v26 = vor.u32 %v4738_v39, %v4370_v38  ;;  %v4729_v3 = vld [vmem:[%s5524_s2 + $0xc] sm:$0xf0]  ;;  %v4338_v0 = vld [vmem:[%s5524_s2 + $0x8] sm:$0xf]  ;;  %v3145_v39 = vperm.slane %v3013_v30, 3 }
 0x630   : > { %v2632_v44 = vmul.f32 %v2628_v41, %v2594_v6  ;;  %v4739_v41 = vld [vmem:[%s5524_s2 + $0x74] sm:$0xf0]  ;;  %v4335_v4 = vor.u32 %v4729_v3, %v4334_v2 }
 0x631   : > { %v2635_v45 = vpack.c.bf16 %v2631_v42, %v2631_v42  ;;  %3175 = vmatpush.bf16.msra.mxu2 %v4427_v5  ;;  %v4737_v42 = vld [vmem:[%s5524_s2 + $0x6c] sm:$0xf]  ;;  %3153 = vmatpush.bf16.msrb.mxu0 %v4371_v26  ;;  %v4730_v5 = vld [vmem:[%s5524_s2 + $0x14] sm:$0xf0] }
 0x632   : > { %v2636_v46 = vpack.c.bf16 %v2632_v44, %v2632_v44  ;;  %v4376_v44 = vld [vmem:[%s5524_s2 + $0x78] sm:$0xf0] }
 0x633   : > { %2931 = vmatmul.bf16.vlgmr.msrb.gmra.mxu2 %v2635_v45  ;;  %v4375_v45 = vor.u32 %v4739_v41, %v4374_v40  ;;  %v4752_v40 = vld [vmem:[%s5527_s11] sm:$0xff] }
 0x634   : > { %2944 = vmatmul.bf16.vlgmr.msra.gmra.mxu3 %v2636_v46  ;;  %v4379_v46 = vor.u32 %v4737_v42, %v4376_v44 }
 0x635   : > { %3176 = vmatpush.bf16.msra.mxu2 %v4415_v17  ;;  %3166 = vmatpush.bf16.msra.mxu1 %v4375_v45 }
 0x639   : > { %3177 = vmatpush.bf16.msra.mxu2 %v4403_v27  ;;  %v4758_v27 = vld [vmem:[%s5527_s11 + $0x30] sm:$0xff] }
 0x63a   : > { %3297 = vmatpush.bf16.msrb.mxu3 %v4758_v27  ;;  %v3247_v27 = vld [vmem:[%s5531_s26] sm:$0x1] }
 0x63d   : > { %3178 = vmatpush.bf16.msra.mxu2 %v4391_v37  ;;  %v4753_v37 = vld [vmem:[%s5527_s11 + $0x8] sm:$0xff] }
 0x63e   : > { %3298 = vmatpush.bf16.msrb.mxu3 %v4757_v28  ;;  %v4770_v28 = vld [vmem:[%s5530_s23 + $0x10] sm:$0xff] }
 0x641   : > { %3179 = vmatpush.bf16.msra.mxu2 %v4379_v46 }
 0x642   : > { %3299 = vmatpush.bf16.msrb.mxu3 %v4756_v29 }
 0x6a9   : > { %v2906_v47 = vpop.f32.mrf.mxu0 }
 0x6aa   : > { %v2919_v48 = vpop.f32.mrf.mxu1  ;;  %v2907_v50 = vadd.f32 %v4841_v49, %v2906_v47  ;;  %v4358_v47 = vld [vmem:[%s5524_s2 + $0x40] sm:$0xf]  ;;  %v4362_v49 = vld [vmem:[%s5524_s2 + $0x48] sm:$0xf] }
 0x6ac   : > { %v2920_v53 = vadd.f32 %v2919_v48, %v2907_v50  ;;  %v4735_v48 = vld [vmem:[%s5524_s2 + $0x4c] sm:$0xf0] }
 0x6ad   : > { %v4359_v50 = vor.u32 %v4735_v48, %v4358_v47  ;;  %v4767_v48 = vld [vmem:[%s5529_s22 + $0x38] sm:$0xff] }
 0x6af   : > { %3154 = vmatpush.bf16.msrb.mxu0 %v4359_v50 }
 0x6b1   : > { %v2908_v51 = vpop.f32.mrf.mxu0 }
 0x6b2   : > { %v2921_v52 = vpop.f32.mrf.mxu1  ;;  %v4736_v51 = vld [vmem:[%s5524_s2 + $0x54] sm:$0xf0] }
 0x6b3   : > { %v4734_v52 = vld [vmem:[%s5524_s2 + $0x4c] sm:$0xf] }
 0x6b6   : > { %v2932_v54 = vpop.f32.mrf.mxu2 }
 0x6b7   : > { %v2933_v55 = vadd.f32 %v2932_v54, %v2920_v53  ;;  %v2945_v56 = vpop.f32.mrf.mxu3  ;;  %v4364_v53 = vld [vmem:[%s5524_s2 + $0x58] sm:$0xf0]  ;;  %v4363_v54 = vor.u32 %v4736_v51, %v4362_v49  ;;  %v4766_v49 = vld [vmem:[%s5529_s22 + $0x30] sm:$0xff]  ;;  %v3144_v51 = vperm.slane %v3013_v30, 2 }
 0x6b9   : > { %v2946_v57 = vadd.f32 %v2945_v56, %v2933_v55  ;;  %v4367_v55 = vor.u32 %v4734_v52, %v4364_v53  ;;  %3167 = vmatpush.bf16.msra.mxu1 %v4363_v54  ;;  %v4346_v56 = vld [vmem:[%s5524_s2 + $0x20] sm:$0xf]  ;;  %v4765_v53 = vld [vmem:[%s5529_s22 + $0x28] sm:$0xff] }
 0x6bb   : > { %v2949_v58 = vadd.f32 %v2946_v57, %v5365_v19  ;;  %3180 = vmatpush.bf16.msra.mxu2 %v4367_v55  ;;  %v4732_v57 = vld [vmem:[%s5524_s2 + $0x2c] sm:$0xf0] }
 0x6bd   : > { %2952 = vadd.xlane.f32.xlu0 %v2949_v58 }
 0x6be   : > { %v2934_v59 = vpop.f32.mrf.mxu2 }
 0x6bf   : > { %v2947_v60 = vpop.f32.mrf.mxu3  ;;  %v4347_v59 = vor.u32 %v4732_v57, %v4346_v56  ;;  %3181 = vmatpush.bf16.msra.mxu2 %v4355_v1 }
 0x6c0   : > { %v4733_v60 = vld [vmem:[%s5524_s2 + $0x34] sm:$0xf0] }
 0x6c1   : > { %3155 = vmatpush.bf16.msrb.mxu0 %v4347_v59 }
 0x6c5   : > { %3156 = vmatpush.bf16.msrb.mxu0 %v4335_v4 }
 0x6c9   : > { %3376 = vmatpush.bf16.msra.mxu0 %v4767_v48  ;;  %v4776_v48 = vld [vmem:[%s5077_s30] sm:$0xff] }
 0x6cd   : > { %3377 = vmatpush.bf16.msra.mxu0 %v4766_v49  ;;  %v3406_v49 = vld [vmem:[%s5072_s20] sm:$0x1] }
 0x6d1   : > { %3378 = vmatpush.bf16.msra.mxu0 %v4765_v53 }
 0x730   : > { %v2953_v19 = vpop.xlane.xlu0 %2952 }
 0x731   : > { %v2954_v6 = vmul.f32 %v2953_v19, %v5134_v33  ;;  %v4728_v19 = vld [vmem:[%s5524_s2 + $0xc] sm:$0xf] }
 0x733   : > { %v5409_v7 = vsub.f32 %v2949_v58, %v2954_v6  ;;  %v4350_v58 = vld [vmem:[%s5524_s2 + $0x28] sm:$0xf]  ;;  %v4340_v6 = vld [vmem:[%s5524_s2 + $0x18] sm:$0xf0] }
 0x734   : > { %v4351_v63 = vor.u32 %v4733_v60, %v4350_v58  ;;  %v4343_v9 = vor.u32 %v4728_v19, %v4340_v6  ;;  %v4764_v58 = vld [vmem:[%s5529_s22 + $0x20] sm:$0xff] }
 0x735   : > { %v2956_v8 = vmul.f32 %v5409_v7, %v5409_v7  ;;  %3379 = vmatpush.bf16.msra.mxu0 %v4764_v58 }
 0x736   : > { %3168 = vmatpush.bf16.msra.mxu1 %v4351_v63  ;;  %3182 = vmatpush.bf16.msra.mxu2 %v4343_v9  ;;  %v4763_v63 = vld [vmem:[%s5529_s22 + $0x18] sm:$0xff] }
 0x737   : > { %2957 = vadd.xlane.f32.xlu1 %v2956_v8  ;;  %v4339_v8 = vor.u32 %v4730_v5, %v4338_v0 }
 0x739   : > { %3380 = vmatpush.bf16.msra.mxu0 %v4763_v63 }
 0x73a   : > { %3169 = vmatpush.bf16.msra.mxu1 %v4339_v8 }
 0x7aa   : > { %v2958_v10 = vpop.xlane.xlu1 %2957 }
 0x7ab   : > { %v2959_v11 = vmul.f32 %v2958_v10, %v5134_v33 }
 0x7ad   : > { %v2960_v12 = vadd.f32 1e-05, %v2959_v11 }
 0x7af   : > { %4874 = vrsqrt.f32 %v2960_v12  ;;  %vm2967_vm11 = vweird.f32 %v2960_v12 }
 0x7b5   : > { %v4875_v13 = vpop.eup %4874 }
 0x7b6   : > { %v2962_v14 = vmul.f32 %v4875_v13, %v2960_v12  ;;  %vm2968_vm10 = vweird.f32 %v4875_v13 }
 0x7b7   : > { %vm2969_vm12 = vmor %vm2967_vm11, %vm2968_vm10 }
 0x7b8   : > { %v2963_v15 = vmul.f32 %v4875_v13, %v2962_v14 }
 0x7ba   : > { %v2964_v16 = vmul.f32 0.5, %v2963_v15 }
 0x7bc   : > { %v2965_v17 = vsub.f32 1.5, %v2964_v16 }
 0x7be   : > { %v2966_v18 = vmul.f32 %v4875_v13, %v2965_v17 }
 0x7c0   : > { %v2970_v21 = vsel %vm2969_vm12, %v4875_v13, %v2966_v18 }
 0x7c1   : > { %v2971_v33 = vmul.f32 %v2970_v21, %v5409_v7  ;;  %v4755_v7 = vld [vmem:[%s5527_s11 + $0x18] sm:$0xff]  ;;  %v4761_v21 = vld [vmem:[%s5529_s22 + $0x8] sm:$0xff] }
 0x7c2   : > { %3300 = vmatpush.bf16.msrb.mxu3 %v4755_v7  ;;  %v4769_v7 = vld [vmem:[%s5530_s23 + $0x8] sm:$0xff] }
 0x7c3   : > { %v2975_v43 = vmul.f32 %v4842_v20, %v2971_v33  ;;  %v4762_v20 = vld [vmem:[%s5529_s22 + $0x10] sm:$0xff]  ;;  %v4760_v33 = vld [vmem:[%s5529_s22] sm:$0xff] }
 0x7c4   : > { %3381 = vmatpush.bf16.msra.mxu0 %v4762_v20 }
 0x7c5   : > { %v2979_v23 = vadd.f32 %v4843_v22, %v2975_v43  ;;  %v4775_v22 = vld [vmem:[%s5530_s23 + $0x38] sm:$0xff]  ;;  %v4774_v43 = vld [vmem:[%s5530_s23 + $0x30] sm:$0xff] }
 0x7c6   : > { %3301 = vmatpush.bf16.msrb.mxu3 %v4754_v35  ;;  %3455 = vmatpush.bf16.msrb.mxu1 %v4775_v22  ;;  %v4768_v35 = vld [vmem:[%s5530_s23] sm:$0xff] }
 0x7c7   : > { %v2980_v24 = vpack.c.bf16 %v2979_v23, %v2979_v23  ;;  %v4773_v23 = vld [vmem:[%s5530_s23 + $0x28] sm:$0xff] }
 0x7c8   : > { %3382 = vmatpush.bf16.msra.mxu0 %v4761_v21 }
 0x7c9   : > { %3157 = vmatmul.bf16.vlgmr.msrb.gmra.mxu0 %v2980_v24  ;;  %3170 = vmatmul.bf16.vlgmr.msra.gmra.mxu1 %v2980_v24 }
 0x7ca   : > { %3183 = vmatmul.bf16.vlgmr.msra.gmra.mxu2 %v2980_v24  ;;  %3302 = vmatpush.bf16.msrb.mxu3 %v4753_v37  ;;  %v4772_v24 = vld [vmem:[%s5530_s23 + $0x20] sm:$0xff]  ;;  %v4782_v37 = vld [vmem:[%s5077_s30 + $0x30] sm:$0xff] }
 0x7cb   : > { %3456 = vmatpush.bf16.msrb.mxu1 %v4774_v43 }
 0x7cc   : > { %3383 = vmatpush.bf16.msra.mxu0 %v4760_v33 }
 0x7ce   : > { %3303 = vmatpush.bf16.msrb.mxu3 %v4752_v40  ;;  %v4779_v40 = vld [vmem:[%s5077_s30 + $0x18] sm:$0xff] }
 0x7cf   : > { %3457 = vmatpush.bf16.msrb.mxu1 %v4773_v23 }
 0x7d3   : > { %3458 = vmatpush.bf16.msrb.mxu1 %v4772_v24 }
 0x7d7   : > { %3459 = vmatpush.bf16.msrb.mxu1 %v4771_v25 }
 0x7db   : > { %3460 = vmatpush.bf16.msrb.mxu1 %v4770_v28 }
 0x7df   : > { %3461 = vmatpush.bf16.msrb.mxu1 %v4769_v7 }
 0x7e3   : > { %3462 = vmatpush.bf16.msrb.mxu1 %v4768_v35 }
 0x846   : > { %v3158_v32 = vpop.f32.mrf.mxu0  ;;  %v3171_v34 = vpop.f32.mrf.mxu1 }
 0x847   : > { %v3159_v36 = vadd.f32 %v3158_v32, %v3143_v31  ;;  %v3172_v56 = vadd.f32 %v3171_v34, %v3144_v51 }
 0x849   : > { %v4428_v38 = vmul.f32 -1.442695, %v3159_v36  ;;  %v4783_v36 = vld [vmem:[%s5077_s30 + $0x38] sm:$0xff] }
 0x84a   : > { %3534 = vmatpush.bf16.msrb.mxu2 %v4783_v36 }
 0x84b   : > { %4876 = vpow2.f32 %v4428_v38  ;;  %v4781_v38 = vld [vmem:[%s5077_s30 + $0x28] sm:$0xff] }
 0x84d   : > { %v3184_v26 = vpop.f32.mrf.mxu2 }
 0x84e   : > { %v3185_v41 = vadd.f32 %v3184_v26, %v3145_v39  ;;  %v3160_v42 = vpop.f32.mrf.mxu0  ;;  %v3173_v44 = vpop.f32.mrf.mxu1  ;;  %3535 = vmatpush.bf16.msrb.mxu2 %v4782_v37  ;;  %v4780_v39 = vld [vmem:[%s5077_s30 + $0x20] sm:$0xff]  ;;  %v4778_v26 = vld [vmem:[%s5077_s30 + $0x10] sm:$0xff] }
 0x84f   : > { %v4777_v42 = vld [vmem:[%s5077_s30 + $0x8] sm:$0xff] }
 0x850   : > { %v4429_v45 = vmul.f32 -1.442695, %v3185_v41  ;;  %v3327_v41 = vld [vmem:[%s5532_s28] sm:$0x1] }
 0x851   : > { %v4877_v46 = vpop.eup %4876 }
 0x852   : > { %v3191_v47 = vadd.f32 1.0, %v4877_v46  ;;  %4878 = vpow2.f32 %v4429_v45  ;;  %3536 = vmatpush.bf16.msrb.mxu2 %v4781_v38 }
 0x854   : > { %4880 = vrcp.f32 %v3191_v47  ;;  %v3203_v60 = vand.u32 2147483648, %v3191_v47  ;;  %v3201_v62 = vand.u32 2147483647, %v3191_v47  ;;  %vm3197_vm14 = vweird.f32 %v3191_v47 }
 0x855   : > { %v3186_v50 = vpop.f32.mrf.mxu2 }
 0x856   : > { %v3204_v3 = vor.u32 1.1754944e-38, %v3203_v60  ;;  %vm3202_vm0 = vcmp.eq.f32.partialorder %v3201_v62, 8.507059e+37  ;;  %3537 = vmatpush.bf16.msrb.mxu2 %v4780_v39 }
 0x858   : > { %v4879_v52 = vpop.eup %4878 }
 0x859   : > { %v3211_v54 = vadd.f32 1.0, %v4879_v52 }
 0x85a   : > { %v4881_v55 = vpop.eup %4880  ;;  %3538 = vmatpush.bf16.msrb.mxu2 %v4779_v40 }
 0x85b   : > { %v3193_v57 = vmul.f32 %v4881_v55, %v3191_v47  ;;  %4882 = vrcp.f32 %v3211_v54  ;;  %vm3198_vm13 = vweird.f32 %v4881_v55  ;;  %v3223_v10 = vand.u32 2147483648, %v3211_v54 }
 0x85c   : > { %4884 = vtanh.f32 %v3172_v56  ;;  %vm3199_vm15 = vmor %vm3197_vm14, %vm3198_vm13  ;;  %vm3217_vm2 = vweird.f32 %v3211_v54  ;;  %v3221_v12 = vand.u32 2147483647, %v3211_v54 }
 0x85d   : > { %v3194_v59 = vsub.f32 1.0, %v3193_v57  ;;  %v3224_v14 = vor.u32 1.1754944e-38, %v3223_v10 }
 0x85e   : > { %vm3222_vm4 = vcmp.eq.f32.partialorder %v3221_v12, 8.507059e+37  ;;  %3539 = vmatpush.bf16.msrb.mxu2 %v4778_v26 }
 0x85f   : > { %v3195_v61 = vmul.f32 %v4881_v55, %v3194_v59 }
 0x861   : > { %v4883_v1 = vpop.eup %4882  ;;  %v3196_v2 = vadd.f32 %v4881_v55, %v3195_v61 }
 0x862   : > { %v3213_v0 = vmul.f32 %v4883_v1, %v3211_v54  ;;  %v4885_v5 = vpop.eup %4884  ;;  %vm3218_vm1 = vweird.f32 %v4883_v1  ;;  %3540 = vmatpush.bf16.msrb.mxu2 %v4777_v42  ;;  %v3485_v54 = vld [vmem:[%s5082_s4] sm:$0x1] }
 0x863   : > { %v3200_v4 = vsel %vm3199_vm15, %v4881_v55, %v3196_v2  ;;  %vm3219_vm3 = vmor %vm3217_vm2, %vm3218_vm1 }
 0x864   : > { %v3205_v19 = vsel %vm3202_vm0, %v3204_v3, %v3200_v4  ;;  %v3214_v6 = vsub.f32 1.0, %v3213_v0 }
 0x865   : > { %v3227_v8 = vmul.f32 %v4885_v5, %v3205_v19 }
 0x866   : > { %v3215_v9 = vmul.f32 %v4883_v1, %v3214_v6  ;;  %3541 = vmatpush.bf16.msrb.mxu2 %v4776_v48 }
 0x867   : > { %4886 = vtanh.f32 %v3227_v8 }
 0x868   : > { %v3216_v11 = vadd.f32 %v4883_v1, %v3215_v9 }
 0x86a   : > { %v3220_v13 = vsel %vm3219_vm3, %v4883_v1, %v3216_v11 }
 0x86b   : > { %v3225_v16 = vsel %vm3222_vm4, %v3224_v14, %v3220_v13 }
 0x86d   : > { %v4887_v15 = vpop.eup %4886 }
 0x86e   : > { %v3229_v17 = vmul.f32 %v4887_v15, %v3225_v16 }
 0x870   : > { %v3230_v18 = vpack.c.bf16 %v3229_v17, %v3229_v17 }
 0x872   : > { %3304 = vmatmul.bf16.vlgmr.msrb.gmra.mxu3 %v3230_v18 }
 0x8f5   : > { %v3305_v29 = vpop.f32.mrf.mxu3 }
 0x8f6   : > { %v3306_v30 = vadd.f32 %v3305_v29, %v3247_v27 }
 0x8f8   : > { %4888 = vtanh.f32 %v3306_v30 }
 0x8fd   : > { %v3307_v31 = vpop.f32.mrf.mxu3 }
 0x8fe   : > { %v4889_v32 = vpop.eup %4888 }
 0x8ff   : > { %v3310_v34 = vpack.c.bf16 %v4889_v32, %v4889_v32 }
 0x901   : > { %3384 = vmatmul.bf16.vlgmr.msra.gmra.mxu0 %v3310_v34 }
 0x97e   : > { %v3385_v44 = vpop.f32.mrf.mxu0 }
 0x97f   : > { %v3386_v45 = vadd.f32 %v3385_v44, %v3327_v41 }
 0x981   : > { %v3389_v46 = vpack.c.bf16 %v3386_v45, %v3386_v45 }
 0x983   : > { %3463 = vmatmul.bf16.vlgmr.msrb.gmra.mxu1 %v3389_v46 }
 0x986   : > { %v3387_v47 = vpop.f32.mrf.mxu0 }
 0xa00   : > { %v3464_v50 = vpop.f32.mrf.mxu1 }
 0xa01   : > { %v3465_v51 = vadd.f32 %v3464_v50, %v3406_v49 }
 0xa03   : > { %v3468_v52 = vpack.c.bf16 %v3465_v51, %v3465_v51 }
 0xa05   : > { %3542 = vmatmul.bf16.vlgmr.msrb.gmra.mxu2 %v3468_v52 }
 0xa08   : > { %v3466_v53 = vpop.f32.mrf.mxu1 }
 0xa88   : > { %v3543_v55 = vpop.f32.mrf.mxu2 }
 0xa89   : > { %v3544_v56 = vadd.f32 %v3543_v55, %v3485_v54 }
 0xa8b   : > { %v3547_v57 = vperm.slane %v3544_v56, 0 }
 0xa8d   : > { %3548 = vst [vmem:[%s939_s1] sm:$0xff] %v3547_v57 }
 0xa90   : > { %v3545_v58 = vpop.f32.mrf.mxu2 }
 0xa91 PF: > { %s71_s15 = sadd.s32 1, %s4896_s15  }
 0xa92   : > { %p68_p4 = scmp.ge.s32.totalorder %s71_s15, 4  }
 0xa94   :  { %70 = sbr.rel (!%p68_p4) target bundleno = 45 (0x2d), region = 203 }

</bundles_post_ra>
